<compile_context>
chip_gen: v6e
topology: v6e:2x2x1
jax: 0.10.0
libtpu: 0.0.40
codegen_flags: <defaults>
</compile_context>

<pallas_src>
import jax
import jax.numpy as jnp
from jax.experimental import pallas as pl
from jax.experimental.pallas import tpu as pltpu


def _round_up(a, m):
    return ((a + m - 1) // m) * m


def _choose_tile(n, tile_n):
    tile_n = max(128, (tile_n // 128) * 128)
    if n <= 256:
        return n                              # single full-extent block (always legal)
    # >= 2 grid steps so both v7x TensorCores get work; multiple of 128 keeps the
    # transposed (B, tile) output block lane-aligned even with a ragged grid.
    return min(tile_n, _round_up(pl.cdiv(n, 2), 128))


def pack_gated_att_params(w_v, b_v, w_u, b_u, w_w, b_w, *,
                          compute_dtype=jnp.bfloat16):
    """Pre-fuse/pad parameters (torch nn.Linear layout) for gated_att_forward.

    Call ONCE outside the per-bag hot path.  `compute_dtype` controls the MXU
    input precision of the big (N, E) @ (E, 2H) matmul (accumulation is always
    f32).  Pass jnp.float32 if bit-tight accuracy is required.
    """
    hidden = w_v.shape[0]
    branches = w_w.shape[0]
    hp = _round_up(hidden, 128)               # lane-aligned V/U split point
    bp = _round_up(branches, 8)               # sublane-aligned tiny-matmul lhs

    def pad_wt(w):                            # (H, E) -> (E, Hp)
        return jnp.pad(jnp.asarray(w).T, ((0, 0), (0, hp - hidden)))

    def pad_b(b):                             # (H,) -> (Hp,)
        return jnp.pad(jnp.asarray(b, jnp.float32), (0, hp - hidden))

    # NOTE: V comes first, U second in both the fused weight and the fused bias.
    w_vu = jnp.concatenate([pad_wt(w_v), pad_wt(w_u)], axis=1).astype(compute_dtype)
    b_vu = jnp.concatenate([pad_b(b_v), pad_b(b_u)])[None, :]                    # (1, 2Hp) f32
    ww = jnp.pad(jnp.asarray(w_w, jnp.float32),
                 ((0, bp - branches), (0, hp - hidden)))                          # (Bp, Hp) f32
    bw = jnp.pad(jnp.asarray(b_w, jnp.float32), (0, bp - branches))[:, None]      # (Bp, 1)  f32
    return (w_vu, b_vu, ww, bw, branches)


def _gated_att_kernel(x_ref, wvu_ref, bvu_ref, ww_ref, bw_ref, at_ref):
    hp = wvu_ref.shape[1] // 2                # lane-padded hidden size
    nb = at_ref.shape[0]                      # ATTENTION_BRANCHES

    x = x_ref[...]
    if x.dtype != wvu_ref.dtype:
        x = x.astype(wvu_ref.dtype)           # bf16 MXU inputs; f32 accumulation below

    # One fused (tile, E) @ (E, 2*Hp) MXU matmul covers both attention branches.
    h = (jnp.dot(x, wvu_ref[...], preferred_element_type=jnp.float32)
         + bvu_ref[...])

    av = jnp.tanh(h[:, :hp])                        # attention_V: Linear -> Tanh
    au = 0.5 * (jnp.tanh(0.5 * h[:, hp:]) + 1.0)    # attention_U: sigmoid via one EUP tanh
    gated = av * au                                 # (tile, Hp), f32 on the VPU

    # attention_w, computed transposed so the output block is lane-dense:
    #   (Bp, Hp) . (tile, Hp)^T -> (Bp, tile).  Tiny f32 matmul (~0.05% of the
    #   main matmul's MACs); padded rows/cols are zeros and contribute 0.
    a_t = jax.lax.dot_general(
        ww_ref[...], gated,
        dimension_numbers=(((1,), (1,)), ((), ())),
        preferred_element_type=jnp.float32) + bw_ref[...]
    at_ref[...] = a_t[:nb, :].astype(at_ref.dtype)


def gated_att_forward(x, packed, *, tile_n=512, vmem_limit_bytes=None):
    """Forward pass of GatedAtt_net with pre-packed params. Returns (A, x)."""
    w_vu, b_vu, ww, bw, branches = packed
    n, e = x.shape
    two_hp = w_vu.shape[1]
    bp, hp = ww.shape

    tile = _choose_tile(n, tile_n)
    grid = (pl.cdiv(n, tile),)                # no jnp.pad of x; ragged tail is masked

    a_t = pl.pallas_call(
        _gated_att_kernel,
        out_shape=jax.ShapeDtypeStruct((branches, n), jnp.float32),
        grid_spec=pltpu.PrefetchScalarGridSpec(
            num_scalar_prefetch=0,
            grid=grid,
            in_specs=[
                pl.BlockSpec((tile, e), lambda i: (i, 0)),      # x tile
                pl.BlockSpec((e, two_hp), lambda i: (0, 0)),    # [W_V | W_U] (resident)
                pl.BlockSpec((1, two_hp), lambda i: (0, 0)),    # [b_V | b_U]
                pl.BlockSpec((bp, hp), lambda i: (0, 0)),       # W_w (padded, torch layout)
                pl.BlockSpec((bp, 1), lambda i: (0, 0)),        # b_w
            ],
            out_specs=pl.BlockSpec((branches, tile), lambda i: (0, i)),
        ),
        compiler_params=pltpu.CompilerParams(
            dimension_semantics=("parallel",),
            vmem_limit_bytes=vmem_limit_bytes),
    )(x, w_vu, b_vu, ww, bw)

    # Tiny (B, N) -> (N, B) relayout in the wrapper; Dropout(p=0.0) is identity,
    # x is passed through unchanged.
    return a_t.T, x


def gated_att_net(x, w_v, b_v, w_u, b_u, w_w, b_w, *,
                  compute_dtype=jnp.bfloat16, tile_n=512, vmem_limit_bytes=None):
    """Convenience one-shot API (re-packs weights each call).  For repeated
    calls, pack once with pack_gated_att_params + gated_att_forward."""
    packed = pack_gated_att_params(w_v, b_v, w_u, b_u, w_w, b_w,
                                   compute_dtype=compute_dtype)
    return gated_att_forward(x, packed, tile_n=tile_n,
                             vmem_limit_bytes=vmem_limit_bytes)


def _reference(x, w_v, b_v, w_u, b_u, w_w, b_w):
    av = jnp.tanh(x @ w_v.T + b_v)
    au = jax.nn.sigmoid(x @ w_u.T + b_u)
    return (av * au) @ w_w.T + b_w


if __name__ == "__main__":
    # Module-default sizes (embed_size=1024, hidden_size=128, ATTENTION_BRANCHES=1).
    E, H, B = 1024, 128, 1

    key = jax.random.PRNGKey(0)
    kx, kv, kbv, ku, kbu, kw, kbw = jax.random.split(key, 7)
    lim_e = float(1.0 / (E ** 0.5))
    lim_h = float(1.0 / (H ** 0.5))

    # Deterministic Linear-like init, stored in torch layout (out_features, in_features).
    w_v = jax.random.uniform(kv, (H, E), jnp.float32, -lim_e, lim_e)
    b_v = jax.random.uniform(kbv, (H,), jnp.float32, -lim_e, lim_e)
    w_u = jax.random.uniform(ku, (H, E), jnp.float32, -lim_e, lim_e)
    b_u = jax.random.uniform(kbu, (H,), jnp.float32, -lim_e, lim_e)
    w_w = jax.random.uniform(kw, (B, H), jnp.float32, -lim_h, lim_h)
    b_w = jax.random.uniform(kbw, (B,), jnp.float32, -lim_h, lim_h)

    packed_bf16 = pack_gated_att_params(w_v, b_v, w_u, b_u, w_w, b_w)  # default bf16 MXU
    packed_f32 = pack_gated_att_params(w_v, b_v, w_u, b_u, w_w, b_w,
                                       compute_dtype=jnp.float32)

    # N=300 with tile_n=512 -> tile=256: two grid steps (v7x megacore) plus a
    # ragged, unpadded last block.
    x = jax.random.normal(kx, (300, E), dtype=jnp.float32)
    A_ref = _reference(x, w_v, b_v, w_u, b_u, w_w, b_w)

    A, x_out = gated_att_forward(x, packed_bf16)
    jax.block_until_ready((A, x_out))
    assert A.shape == (300, B) and x_out.shape == (300, E)
    assert jnp.array_equal(x_out, x)
    assert jnp.allclose(A, A_ref, rtol=2e-2, atol=2e-2), \
        float(jnp.max(jnp.abs(A - A_ref)))

    # f32 MXU path: tight accuracy.
    A32, _ = gated_att_forward(x, packed_f32)
    jax.block_until_ready(A32)
    assert jnp.allclose(A32, A_ref, rtol=1e-5, atol=1e-4), \
        float(jnp.max(jnp.abs(A32 - A_ref)))

    # Tiny-bag path: a single full-extent block (tile == N).
    xs = jax.random.normal(kx, (40, E), dtype=jnp.float32)
    As, xs_out = gated_att_forward(xs, packed_f32)
    jax.block_until_ready((As, xs_out))
    As_ref = _reference(xs, w_v, b_v, w_u, b_u, w_w, b_w)
    assert jnp.allclose(As, As_ref, rtol=1e-5, atol=1e-4), \
        float(jnp.max(jnp.abs(As - As_ref)))
    assert jnp.array_equal(xs_out, xs)

    print("KERNEL_OK")
</pallas_src>

<mosaic_0001>
module attributes {stable_mosaic.version = 11 : i64} {
  func.func @_gated_att_kernel(%arg0: i32, %arg1: memref<256x1024xf32, #tpu.memory_space<vmem>>, %arg2: memref<1024x256xbf16, #tpu.memory_space<vmem>>, %arg3: memref<1x256xf32, #tpu.memory_space<vmem>>, %arg4: memref<8x128xf32, #tpu.memory_space<vmem>>, %arg5: memref<8x1xf32, #tpu.memory_space<vmem>>, %arg6: memref<1x256xf32, #tpu.memory_space<vmem>>) attributes {dimension_semantics = [#tpu.dimension_semantics<parallel>], iteration_bounds = array<i64: 2>, scalar_prefetch = 0 : i64, scratch_operands = 0 : i64, tpu.core_type = #tpu.core_type<tc>, window_params = [{transform_indices = @transform_0, window_bounds = array<i64: 256, 1024>}, {pipeline_mode = #tpu.pipeline_mode<synchronous>, transform_indices = @transform_1, window_bounds = array<i64: 1024, 256>}, {pipeline_mode = #tpu.pipeline_mode<synchronous>, transform_indices = @transform_2, window_bounds = array<i64: 1, 256>}, {pipeline_mode = #tpu.pipeline_mode<synchronous>, transform_indices = @transform_3, window_bounds = array<i64: 8, 128>}, {pipeline_mode = #tpu.pipeline_mode<synchronous>, transform_indices = @transform_4, window_bounds = array<i64: 8, 1>}, {transform_indices = @transform_5, window_bounds = array<i64: 1, 256>}]} {
    %c0 = arith.constant 0 : index
    %c0_0 = arith.constant 0 : index
    %0 = vector.load %arg1[%c0, %c0_0] : memref<256x1024xf32, #tpu.memory_space<vmem>>, vector<256x1024xf32>
    %1 = arith.truncf %0 : vector<256x1024xf32> to vector<256x1024xbf16>
    %c0_1 = arith.constant 0 : index
    %c0_2 = arith.constant 0 : index
    %2 = vector.load %arg2[%c0_1, %c0_2] : memref<1024x256xbf16, #tpu.memory_space<vmem>>, vector<1024x256xbf16>
    %cst = arith.constant dense<0.000000e+00> : vector<256x256xf32>
    %3 = tpu.matmul %1, %2, %cst {dimension_numbers = #tpu.dot_dimension_numbers<[1], [0], [0], [1], [0, 0, 1, 1], [], []>} : vector<256x1024xbf16>, vector<1024x256xbf16>, vector<256x256xf32> -> vector<256x256xf32>
    %c0_3 = arith.constant 0 : index
    %c0_4 = arith.constant 0 : index
    %4 = vector.load %arg3[%c0_3, %c0_4] : memref<1x256xf32, #tpu.memory_space<vmem>>, vector<1x256xf32>
    %5 = vector.broadcast %4 : vector<1x256xf32> to vector<256x256xf32>
    %6 = arith.addf %3, %5 : vector<256x256xf32>
    %7 = vector.extract_strided_slice %6 {offsets = [0, 0], sizes = [256, 128], strides = [1, 1]} : vector<256x256xf32> to vector<256x128xf32>
    %8 = math.tanh %7 : vector<256x128xf32>
    %9 = vector.extract_strided_slice %6 {offsets = [0, 128], sizes = [256, 128], strides = [1, 1]} : vector<256x256xf32> to vector<256x128xf32>
    %cst_5 = arith.constant 5.000000e-01 : f32
    %10 = vector.broadcast %cst_5 : f32 to vector<256x128xf32>
    %11 = arith.mulf %10, %9 : vector<256x128xf32>
    %12 = math.tanh %11 : vector<256x128xf32>
    %cst_6 = arith.constant 1.000000e+00 : f32
    %13 = vector.broadcast %cst_6 : f32 to vector<256x128xf32>
    %14 = arith.addf %12, %13 : vector<256x128xf32>
    %cst_7 = arith.constant 5.000000e-01 : f32
    %15 = vector.broadcast %cst_7 : f32 to vector<256x128xf32>
    %16 = arith.mulf %15, %14 : vector<256x128xf32>
    %17 = arith.mulf %8, %16 : vector<256x128xf32>
    %c0_8 = arith.constant 0 : index
    %c0_9 = arith.constant 0 : index
    %18 = vector.load %arg4[%c0_8, %c0_9] : memref<8x128xf32, #tpu.memory_space<vmem>>, vector<8x128xf32>
    %cst_10 = arith.constant dense<0.000000e+00> : vector<8x256xf32>
    %19 = tpu.matmul %18, %17, %cst_10 {dimension_numbers = #tpu.dot_dimension_numbers<[1], [1], [0], [0], [0, 0, 1, 0], [], []>} : vector<8x128xf32>, vector<256x128xf32>, vector<8x256xf32> -> vector<8x256xf32>
    %c0_11 = arith.constant 0 : index
    %c0_12 = arith.constant 0 : index
    %20 = vector.load %arg5[%c0_11, %c0_12] : memref<8x1xf32, #tpu.memory_space<vmem>>, vector<8x1xf32>
    %21 = vector.broadcast %20 : vector<8x1xf32> to vector<8x256xf32>
    %22 = arith.addf %19, %21 : vector<8x256xf32>
    %23 = vector.extract_strided_slice %22 {offsets = [0, 0], sizes = [1, 256], strides = [1, 1]} : vector<8x256xf32> to vector<1x256xf32>
    %c0_13 = arith.constant 0 : index
    %c0_14 = arith.constant 0 : index
    %24 = vector.load %arg6[%c0_13, %c0_14] : memref<1x256xf32, #tpu.memory_space<vmem>>, vector<1x256xf32>
    tpu.vector_store %arg6[%c0_13, %c0_14], %23 {strides = array<i32>} : memref<1x256xf32, #tpu.memory_space<vmem>>, vector<1x256xf32>,
    return
  }
  func.func @transform_0(%arg0: i32) -> (i32, i32) {
    %c0_i32 = arith.constant 0 : i32
    %c0_i32_0 = arith.constant 0 : i32
    return %arg0, %c0_i32 : i32, i32
  }
  func.func @transform_1(%arg0: i32) -> (i32, i32) {
    %c0_i32 = arith.constant 0 : i32
    %c0_i32_0 = arith.constant 0 : i32
    %c0_i32_1 = arith.constant 0 : i32
    return %c0_i32, %c0_i32_0 : i32, i32
  }
  func.func @transform_2(%arg0: i32) -> (i32, i32) {
    %c0_i32 = arith.constant 0 : i32
    %c0_i32_0 = arith.constant 0 : i32
    %c0_i32_1 = arith.constant 0 : i32
    return %c0_i32, %c0_i32_0 : i32, i32
  }
  func.func @transform_3(%arg0: i32) -> (i32, i32) {
    %c0_i32 = arith.constant 0 : i32
    %c0_i32_0 = arith.constant 0 : i32
    %c0_i32_1 = arith.constant 0 : i32
    return %c0_i32, %c0_i32_0 : i32, i32
  }
  func.func @transform_4(%arg0: i32) -> (i32, i32) {
    %c0_i32 = arith.constant 0 : i32
    %c0_i32_0 = arith.constant 0 : i32
    %c0_i32_1 = arith.constant 0 : i32
    return %c0_i32, %c0_i32_0 : i32, i32
  }
  func.func @transform_5(%arg0: i32) -> (i32, i32) {
    %c0_i32 = arith.constant 0 : i32
    %c0_i32_0 = arith.constant 0 : i32
    return %c0_i32, %arg0 : i32, i32
  }
}

</mosaic_0001>

<bundles_post_ra>
// kernel: tpu_custom_call.1
= control target key start
LH: loop header
LB: loop body
LE: loop exit
PB: predicated region body
PF: predicated region fallthrough
CT: control target
= control target key end

     0   :  { %10 = vsyncpa [#allocation3], 0  ;;  %s4283_s0 = inlined_call_operand.hbm [shape: f32[300,1024], index: 0, kind: input, shape index: {}]   ;;  %s4284_s1 = inlined_call_operand.hbm [shape: bf16[1024,256], index: 1, kind: input, shape index: {}]   ;;  %s4285_s2 = inlined_call_operand.hbm [shape: f32[1,256], index: 2, kind: input, shape index: {}]   ;;  %s4286_s3 = inlined_call_operand.hbm [shape: f32[8,128], index: 3, kind: input, shape index: {}]   ;;  %s4287_s4 = inlined_call_operand.vmem [shape: f32[8,1], index: 4, kind: input, shape index: {}]   ;;  %s4288_s5 = inlined_call_operand.hbm [shape: f32[1,300], index: 5, kind: output, shape index: {}]  }
   0x1   :  { %12 = vsyncpa [#allocation3 + $0x1], 0 }
   0x2   :  { %13 = vsyncpa [#allocation6], 0 }
   0x3   :  { %14 = vsyncpa [#allocation9], 0 }
   0x4   :  { %15 = vsyncpa [#allocation4], 0 }
   0x5   :  { %17 = vsyncpa [#allocation4 + $0x1], 0  ;;  %s3460_s18 = smov 0   ;;  %s3462_s19 = smov 0  }
   0x6   :  { %s3464_s20 = smov 0   ;;  %s3466_s21 = smov 0  }
   0x7 LB: > { %s3481_s22 = sadd.s32 4294967295, %s3417_s21   ;;  %s2650_s23 = sadd.s32 4294967294, %s3417_s21   ;;  %s3417_s21 = sphi %s3466_s21, %s4352_s21   ;;  %s3413_s20 = sphi %s3464_s20, %s4351_s20   ;;  %s3409_s19 = sphi %s3462_s19, %s4350_s19   ;;  %s3405_s18 = sphi %s3460_s18, %s4349_s18  }
   0x8   : > { %s3485_s24 = sadd.s32 1, %s3417_s21   ;;  %s30_s25 = sadd.s32 1, %s3413_s20 }
   0x9   : > { %s27_s26 = ssub.s32 %s3417_s21, %s3485_s24  ;;  %p37_p0 = scmp.ne.s32.totalorder %s3413_s20, %s3409_s19 }
   0xa   : > { %p28_p1 = scmp.eq.s32.totalorder %s27_s26, 0  ;;  %p38_p2 = scmp.eq.s32.totalorder %s3417_s21, 0 }
   0xb   : > { %p43_p3 = scmp.ne.s32.totalorder %s3409_s19, %s3405_s18  ;;  %p4289_p4 = scmp.eq.s32.totalorder %s3481_s22, 0 }
   0xc   : > { %s3497_s27 = scalar_select %p28_p1, %s3413_s20, %s30_s25  }
   0xd   : > { %p3499_p5 = por %p38_p2, %p37_p0  ;;  %p3505_p6 = por %p4289_p4, %p43_p3 }
   0xe   : > { %p151_p7 = scmp.eq.s32.totalorder %s3481_s22, 1  ;;  %p157_p8 = scmp.eq.s32.totalorder %s2650_s23, 1 }
   0xf   : > { %s4294_s29 = scalar_select %p3505_p6, 1, 0 }
  0x10   : > { %p2651_p9 = scmp.ge.s32.totalorder %s3417_s21, 1  ;;  %p164_p10 = scmp.lt.s32.totalorder %s3417_s21, 3 }
  0x11   : > { %p3512_p11 = por %p151_p7, %p37_p0  ;;  %p3516_p12 = por %p157_p8, %p43_p3 }
  0x12   : > { %p3520_p13 = pnand %p2651_p9, %p164_p10  ;;  %s3419_s8 = smov [#allocation5]  }
  0x13   : > { %s4295_s30 = scalar_select %p3512_p11, 1, 0 }
  0x14   : > { %s4296_s6 = scalar_select %p3516_p12, 1, 0 }
  0x15   : > { %p2858_p1 = pneg %p3520_p13  ;;  %s176_s9 = sshll.u32 %s3419_s8, 4  ;;  %s177_s9 = int_to_ptr.vmem [resolvable:$true] %s176_s9 }
  0x16   : > { %s3420_s11 = smov [#allocation7]   ;;  %s3252_s13 = scalar_lea.vmem %s177_s9, 16384 }
  0x17   : > { %p3528_p2 = pnand %p2858_p1, %p4289_p4  ;;  %s190_s12 = sshll.u32 %s3420_s11, 4  ;;  %s191_s12 = int_to_ptr.vmem [resolvable:$true] %s190_s12 }
  0x18   : > { %p3253_p3 = scmp.ne.s32.totalorder %s177_s9, %s3252_s13  ;;  %p3260_p9 = scmp.lt.s32.totalorder %s177_s9, %s177_s9 }
  0x19   : > { %p3243_p0 = pneg %p3528_p2  ;;  %p3261_p10 = scmp.lt.s32.totalorder %s3252_s13, %s3252_s13 }
  0x1b   : > { %p3255_p7 = pnand %p3253_p3, %p3243_p0  ;;  %p3262_p12 = por %p3261_p10, %p3260_p9 }
  0x1d   : > { %p3256_p8 = pneg %p3255_p7 }
  0x1f   : > { %p3263_p1 = pnand %p3262_p12, %p3256_p8 }
  0x21   : > { %3266 = shalt.err (!%p3263_p1)
}
  0x22   : > { %s3421_s14 = smov 128   ;;  %s3422_s15 = smov 8  }
  0x23   : > { %2861 = dma.hbm_to_vmem [thread:$0]  (!%p3528_p2), %s4284_s1, 16384, %s177_s9, [#allocation6], %s3421_s14, %s3421_s14, %s3422_s15  }
  0x24   : > { %s3278_s23 = scalar_lea.vmem %s191_s12, 32  ;;  %p3286_p11 = scmp.lt.s32.totalorder %s191_s12, %s191_s12 }
  0x25   : > { %p3279_p4 = scmp.ne.s32.totalorder %s191_s12, %s3278_s23  ;;  %p3287_p6 = scmp.lt.s32.totalorder %s3278_s23, %s3278_s23 }
  0x27   : > { %p3281_p3 = pnand %p3279_p4, %p3243_p0  ;;  %p3288_p9 = por %p3287_p6, %p3286_p11 }
  0x29   : > { %p3282_p7 = pneg %p3281_p3 }
  0x2b   : > { %p3289_p12 = pnand %p3288_p9, %p3282_p7 }
  0x2d   : > { %3292 = shalt.err (!%p3289_p12)
}
  0x2e   : > { %2864 = dma.hbm_to_vmem [thread:$0]  (!%p3528_p2), %s4285_s2, 32, %s191_s12, [#allocation6]  }
  0x2f   : > { %s3423_s8 = smov [#allocation8]  }
  0x30   : > { %s201_s9 = sshll.u32 %s3423_s8, 4  ;;  %s202_s9 = int_to_ptr.vmem [resolvable:$true] %s201_s9 }
  0x31   : > { %s3304_s11 = scalar_lea.vmem %s202_s9, 128  ;;  %p3312_p1 = scmp.lt.s32.totalorder %s202_s9, %s202_s9 }
  0x32   : > { %p3305_p8 = scmp.ne.s32.totalorder %s202_s9, %s3304_s11  ;;  %p3313_p6 = scmp.lt.s32.totalorder %s3304_s11, %s3304_s11 }
  0x34   : > { %p3307_p4 = pnand %p3305_p8, %p3243_p0  ;;  %p3314_p11 = por %p3313_p6, %p3312_p1 }
  0x36   : > { %p3308_p10 = pneg %p3307_p4 }
  0x38   : > { %p3315_p3 = pnand %p3314_p11, %p3308_p10 }
  0x3a   : > { %3318 = shalt.err (!%p3315_p3)
}
  0x3b   : > { %2867 = dma.hbm_to_vmem [thread:$0]  (!%p3528_p2), %s4286_s3, 128, %s202_s9, [#allocation9]  }
  0x3c   : > { %p2655_p7 = scmp.ge.s32.totalorder %s3417_s21, 2 }
  0x3e   : > { %211 = sbr.rel (%p2655_p7) target bundleno = 99 (0x63), region = 32 }
  0x43   : > { %214 = sbr.rel (!%p3499_p5) target bundleno = 99 (0x63), region = 36  ;;  %s215_s12 = sand.u32 (%p3499_p5), 1, %s3413_s20  }
  0x44   : > { %s2657_s15 = sshll.u32 (%p3499_p5), %s3417_s21, 5  ;;  %s2656_s16 = sshll.u32 (%p3499_p5), %s215_s12, 11 }
  0x45   : > { %s221_s17 = ssub.s32 (%p3499_p5), 38, %s2657_s15  ;;  %s3568_s25 = scalar_lea.sflag (%p3499_p5), [#allocation3], %s215_s12 }
  0x46   : > { %p222_p0 = scmp.lt.s32.totalorder (%p3499_p5), %s221_s17, 32  ;;  %s219_s26 = scalar_lea.vmem (%p3499_p5), [#allocation2], %s2656_s16 }
  0x48   : > { %s4354_s17 = smov (!%p222_p0, %s221_s17), 32 }
  0x49   : > { %s3565_s10 = sshll.u32 %s4354_s17, 10 }
  0x4a   : > { %s227_s23 = ssub.s32 32768, %s3565_s10 }
  0x4b   : > { %228 = vsyncadd %s3568_s25, %s227_s23  ;;  %p2660_p5 = scmp.ne.s32.totalorder %s3565_s10, 0  ;;  %s2808_s28 = sshll.u32 %s3417_s21, 15 }
  0x4c   : > { %s3576_s11 = scalar_lea.hbm %s4283_s0, %s2808_s28  ;;  %s234_s13 = sshll.u32 %s219_s26, 4  ;;  %s3578_s13 = int_to_ptr.vmem [resolvable:$true] %s234_s13 }
  0x4d   : > { %s3319_s14 = scalar_lea.hbm %s3576_s11, %s3565_s10  ;;  %s3323_s16 = scalar_lea.hbm %s4283_s0, 38912 }
  0x4e   : > { %p3320_p2 = scmp.ne.s32.totalorder %s3576_s11, %s3319_s14  ;;  %p3324_p8 = scmp.lt.s32.totalorder %s3576_s11, %s4283_s0 }
  0x4f   : > { %p3325_p4 = scmp.lt.s32.totalorder %s3323_s16, %s3319_s14 }
  0x50   : > { %p3321_p9 = pnand %p3320_p2, %p2660_p5 }
  0x51   : > { %p3326_p10 = por %p3325_p4, %p3324_p8 }
  0x52   : > { %p3322_p12 = pneg %p3321_p9 }
  0x54   : > { %p3327_p1 = pnand %p3326_p10, %p3322_p12 }
  0x56   : > { %3330 = shalt.err (!%p3327_p1)
}
  0x57   : > { %s3331_s26 = scalar_lea.vmem %s3578_s13, %s3565_s10  ;;  %s3424_s28 = smov [#allocation2]  }
  0x58   : > { %p3332_p6 = scmp.ne.s32.totalorder %s3578_s13, %s3331_s26  ;;  %s3335_s8 = sshll.u32 %s3424_s28, 4  ;;  %s3336_s8 = int_to_ptr.vmem [resolvable:$false] %s3335_s8 }
  0x59   : > { %s3337_s9 = scalar_lea.vmem %s3336_s8, 65536  ;;  %p3338_p0 = scmp.lt.s32.totalorder %s3578_s13, %s3336_s8 }
  0x5a   : > { %p3333_p11 = pnand %p3332_p6, %p2660_p5  ;;  %p3339_p2 = scmp.lt.s32.totalorder %s3337_s9, %s3331_s26 }
  0x5c   : > { %p3334_p3 = pneg %p3333_p11  ;;  %p3340_p9 = por %p3339_p2, %p3338_p0 }
  0x5e   : > { %p3341_p8 = pnand %p3340_p9, %p3334_p3 }
  0x60   : > { %3344 = shalt.err (!%p3341_p8)
}
  0x61   : > { %s3425_s14 = smov 1024   ;;  %s3426_s12 = smov 64  }
  0x62   : > { %240 = dma.hbm_to_vmem [thread:$0]  (%p2660_p5), %s3576_s11, %s3565_s10, %s3578_s13, %s3568_s25, %s3425_s14, %s3425_s14, %s3426_s12  }
  0x63 PF: > { %246 = sbr.rel (%p3520_p13) target bundleno = 946 (0x3b2), region = 40 }
  0x68   : > { %s3607_s15 = sand.u32 1, %s3409_s19   ;;  %p4299_p12 = scmp.ne.s32.totalorder %s4294_s29, 0 }
  0x69   : > { %s2666_s16 = sshll.u32 %s3607_s15, 11  ;;  %s249_s17 = scalar_lea.sflag [#allocation3], %s3607_s15 }
  0x6a   : > { %s3611_s23 = scalar_lea.vmem [#allocation2], %s2666_s16 }
  0x6b   : > { %3388 = dma.done.wait (%p4299_p12), %s249_s17, 32768  }
  0x6c   : > { %3390 = vsyncadd (%p4299_p12), %s249_s17, 4294934528  ;;  %p4300_p5 = scmp.eq.s32.totalorder %s3481_s22, 0 }
  0x6e   : > { %3392 = dma.done.wait (%p4300_p5), [#allocation6], 16416   ;;  %p4301_p13 = pmov %p4300_p5 }
  0x6f   : > { %p4302_p4 = pmov %p4300_p5 }
  0x70   : > { %3394 = vsyncadd (%p4301_p13), [#allocation6], 4294950880 }
  0x71   : > { %3396 = dma.done.wait (%p4302_p4), [#allocation9], 128   ;;  %p4303_p10 = pmov %p4302_p4 }
  0x72   : > { %v2921_v0 = vld [vmem:[#allocation5 + $0x74] ss:$8 sps:$4 sm:$0xff]   ;;  %v2925_v2 = vld [vmem:[#allocation5 + $0x70] ss:$8 sps:$4 sm:$0xff]   ;;  %v2927_v4 = vld [vmem:[#allocation5 + $0x64] ss:$8 sps:$4 sm:$0xff]  }
  0x73   : > { %3398 = vsyncadd (%p4303_p10), [#allocation9], 4294967168  ;;  %v2923_v1 = vld [vmem:[#allocation5 + $0x174] ss:$8 sps:$4 sm:$0xff]   ;;  %1466 = vmatprep.subr.bf16.mxu0 %v2921_v0  ;;  %v2926_v3 = vld [vmem:[#allocation5 + $0x170] ss:$8 sps:$4 sm:$0xff]  }
  0x74   : > { %1659 = vmatprep.subr.bf16.mxu1 %v2923_v1  ;;  %1467 = vmatpush1.bf16.msra.mxu0 %v2925_v2  ;;  %v2929_v5 = vld [vmem:[#allocation5 + $0x164] ss:$8 sps:$4 sm:$0xff]   ;;  %v2931_v6 = vld [vmem:[#allocation5 + $0x60] ss:$8 sps:$4 sm:$0xff]   ;;  %v2933_v8 = vld [vmem:[#allocation5 + $0x54] ss:$8 sps:$4 sm:$0xff]  }
  0x75   : > { %1660 = vmatpush1.bf16.msra.mxu1 %v2926_v3  ;;  %1468 = vmatprep.subr.bf16.mxu0 %v2927_v4  ;;  %v2932_v7 = vld [vmem:[#allocation5 + $0x160] ss:$8 sps:$4 sm:$0xff]   ;;  %v2935_v9 = vld [vmem:[#allocation5 + $0x154] ss:$8 sps:$4 sm:$0xff]   ;;  %v2937_v10 = vld [vmem:[#allocation5 + $0x50] ss:$8 sps:$4 sm:$0xff]  }
  0x76   : > { %1661 = vmatprep.subr.bf16.mxu1 %v2929_v5  ;;  %v2938_v11 = vld [vmem:[#allocation5 + $0x150] ss:$8 sps:$4 sm:$0xff]   ;;  %v2939_v12 = vld [vmem:[#allocation5 + $0x44] ss:$8 sps:$4 sm:$0xff]   ;;  %v2943_v14 = vld [vmem:[#allocation5 + $0x40] ss:$8 sps:$4 sm:$0xff]  }
  0x77   : > { %v2941_v13 = vld [vmem:[#allocation5 + $0x144] ss:$8 sps:$4 sm:$0xff]   ;;  %v2944_v15 = vld [vmem:[#allocation5 + $0x140] ss:$8 sps:$4 sm:$0xff]   ;;  %v2945_v16 = vld [vmem:[#allocation5 + $0x34] ss:$8 sps:$4 sm:$0xff]  }
  0x78   : > { %1469 = vmatpush1.bf16.msra.mxu0 %v2931_v6  ;;  %v2947_v17 = vld [vmem:[#allocation5 + $0x134] ss:$8 sps:$4 sm:$0xff]   ;;  %v2949_v18 = vld [vmem:[#allocation5 + $0x30] ss:$8 sps:$4 sm:$0xff]   ;;  %v2951_v20 = vld [vmem:[#allocation5 + $0x24] ss:$8 sps:$4 sm:$0xff]  }
  0x79   : > { %1662 = vmatpush1.bf16.msra.mxu1 %v2932_v7  ;;  %1470 = vmatprep.subr.bf16.mxu0 %v2933_v8  ;;  %v2950_v19 = vld [vmem:[#allocation5 + $0x130] ss:$8 sps:$4 sm:$0xff]   ;;  %v2953_v21 = vld [vmem:[#allocation5 + $0x124] ss:$8 sps:$4 sm:$0xff]   ;;  %v2955_v22 = vld [vmem:[#allocation5 + $0x20] ss:$8 sps:$4 sm:$0xff]  }
  0x7a   : > { %1663 = vmatprep.subr.bf16.mxu1 %v2935_v9  ;;  %v2956_v23 = vld [vmem:[#allocation5 + $0x120] ss:$8 sps:$4 sm:$0xff]   ;;  %v2957_v24 = vld [vmem:[#allocation5 + $0x14] ss:$8 sps:$4 sm:$0xff]   ;;  %v2961_v26 = vld [vmem:[#allocation5 + $0x10] ss:$8 sps:$4 sm:$0xff]  }
  0x7b   : > { %v2959_v25 = vld [vmem:[#allocation5 + $0x114] ss:$8 sps:$4 sm:$0xff]   ;;  %v2962_v27 = vld [vmem:[#allocation5 + $0x110] ss:$8 sps:$4 sm:$0xff]   ;;  %v2963_v28 = vld [vmem:[#allocation5 + $0x4] ss:$8 sps:$4 sm:$0xff]  }
  0x7c   : > { %1471 = vmatpush1.bf16.msra.mxu0 %v2937_v10  ;;  %v2965_v29 = vld [vmem:[#allocation5 + $0x104] ss:$8 sps:$4 sm:$0xff]   ;;  %v2967_v30 = vld [vmem:[#allocation5] ss:$8 sps:$4 sm:$0xff]   ;;  %v2969_v32 = vld [vmem:[#allocation5 + $0xf4] ss:$8 sps:$4 sm:$0xff]  }
  0x7d   : > { %1664 = vmatpush1.bf16.msra.mxu1 %v2938_v11  ;;  %1472 = vmatprep.subr.bf16.mxu0 %v2939_v12  ;;  %v2968_v31 = vld [vmem:[#allocation5 + $0x100] ss:$8 sps:$4 sm:$0xff]   ;;  %v2971_v33 = vld [vmem:[#allocation5 + $0x1f4] ss:$8 sps:$4 sm:$0xff]   ;;  %v2973_v34 = vld [vmem:[#allocation5 + $0xf0] ss:$8 sps:$4 sm:$0xff]  }
  0x7e   : > { %1665 = vmatprep.subr.bf16.mxu1 %v2941_v13  ;;  %v2974_v35 = vld [vmem:[#allocation5 + $0x1f0] ss:$8 sps:$4 sm:$0xff]   ;;  %v2975_v36 = vld [vmem:[#allocation5 + $0xe4] ss:$8 sps:$4 sm:$0xff]   ;;  %v2979_v38 = vld [vmem:[#allocation5 + $0xe0] ss:$8 sps:$4 sm:$0xff]  }
  0x7f   : > { %v2977_v37 = vld [vmem:[#allocation5 + $0x1e4] ss:$8 sps:$4 sm:$0xff]   ;;  %v2980_v39 = vld [vmem:[#allocation5 + $0x1e0] ss:$8 sps:$4 sm:$0xff]   ;;  %v2981_v40 = vld [vmem:[#allocation5 + $0xd4] ss:$8 sps:$4 sm:$0xff]  }
  0x80   : > { %1473 = vmatpush1.bf16.msra.mxu0 %v2943_v14  ;;  %v2983_v41 = vld [vmem:[#allocation5 + $0x1d4] ss:$8 sps:$4 sm:$0xff]   ;;  %v2985_v42 = vld [vmem:[#allocation5 + $0xd0] ss:$8 sps:$4 sm:$0xff]   ;;  %v2987_v44 = vld [vmem:[#allocation5 + $0xc4] ss:$8 sps:$4 sm:$0xff]  }
  0x81   : > { %1666 = vmatpush1.bf16.msra.mxu1 %v2944_v15  ;;  %1474 = vmatprep.subr.bf16.mxu0 %v2945_v16  ;;  %v2986_v43 = vld [vmem:[#allocation5 + $0x1d0] ss:$8 sps:$4 sm:$0xff]   ;;  %v2989_v45 = vld [vmem:[#allocation5 + $0x1c4] ss:$8 sps:$4 sm:$0xff]   ;;  %v2991_v50 = vld [vmem:[#allocation5 + $0xc0] ss:$8 sps:$4 sm:$0xff]  }
  0x82   : > { %1667 = vmatprep.subr.bf16.mxu1 %v2947_v17  ;;  %v303_v46 = vld [vmem:[%s3611_s23 + $0x8] sm:$0xff]  ;;  %v305_v48 = vld [vmem:[%s3611_s23 + $0x18] sm:$0xff]  ;;  %v302_v6 = vld [vmem:[%s3611_s23] sm:$0xff]  ;;  %s2670_s10 = sshll.u32 %s3607_s15, 1  ;;  %s2532_s11 = scalar_lea.sflag [#allocation4], %s3607_s15 }
  0x83   : > { %v311_v47 = vld [vmem:[%s3611_s23 + $0x48] sm:$0xff]  ;;  %v313_v49 = vld [vmem:[%s3611_s23 + $0x58] sm:$0xff]  ;;  %v310_v7 = vld [vmem:[%s3611_s23 + $0x40] sm:$0xff]  ;;  %s290_s25 = scalar_lea.vmem [#allocation10], %s2670_s10  ;;  %p4347_p1 = scmp.ne.s32.totalorder %s4295_s30, 0 }
  0x84   : > { %1475 = vmatpush1.bf16.msra.mxu0 %v2949_v18  ;;  %v2992_v51 = vld [vmem:[#allocation5 + $0x1c0] ss:$8 sps:$4 sm:$0xff]   ;;  %v559_v52 = vpack.c.bf16 %v311_v47, %v303_v46  ;;  %v561_v53 = vpack.c.bf16 %v313_v49, %v305_v48  ;;  %v2993_v54 = vld [vmem:[#allocation5 + $0xb4] ss:$8 sps:$4 sm:$0xff]   ;;  %v2997_v56 = vld [vmem:[#allocation5 + $0xb0] ss:$8 sps:$4 sm:$0xff]   ;;  %v558_v14 = vpack.c.bf16 %v310_v7, %v302_v6 }
  0x85   : > { %1668 = vmatpush1.bf16.msra.mxu1 %v2950_v19  ;;  %1476 = vmatprep.subr.bf16.mxu0 %v2951_v20  ;;  %v2995_v55 = vld [vmem:[#allocation5 + $0x1b4] ss:$8 sps:$4 sm:$0xff]   ;;  %v2998_v57 = vld [vmem:[#allocation5 + $0x1b0] ss:$8 sps:$4 sm:$0xff]   ;;  %v2999_v58 = vld [vmem:[#allocation5 + $0xa4] ss:$8 sps:$4 sm:$0xff]  }
  0x86   : > { %1669 = vmatprep.subr.bf16.mxu1 %v2953_v21  ;;  %1498 = vmatprep.mubr.bf16.mxu0 %v559_v52  ;;  %v3001_v59 = vld [vmem:[#allocation5 + $0x1a4] ss:$8 sps:$4 sm:$0xff]   ;;  %v3003_v60 = vld [vmem:[#allocation5 + $0xa0] ss:$8 sps:$4 sm:$0xff]   ;;  %v3005_v62 = vld [vmem:[#allocation5 + $0x94] ss:$8 sps:$4 sm:$0xff]  }
  0x87   : > { %1691 = vmatprep.mubr.bf16.mxu1 %v561_v53  ;;  %v3004_v61 = vld [vmem:[#allocation5 + $0x1a0] ss:$8 sps:$4 sm:$0xff]   ;;  %v3007_v63 = vld [vmem:[#allocation5 + $0x194] ss:$8 sps:$4 sm:$0xff]   ;;  %v3009_v0 = vld [vmem:[#allocation5 + $0x90] ss:$8 sps:$4 sm:$0xff]  }
  0x88   : > { %1477 = vmatpush1.bf16.msra.mxu0 %v2955_v22  ;;  %v3010_v1 = vld [vmem:[#allocation5 + $0x190] ss:$8 sps:$4 sm:$0xff]   ;;  %v3011_v2 = vld [vmem:[#allocation5 + $0x84] ss:$8 sps:$4 sm:$0xff]   ;;  %v3015_v4 = vld [vmem:[#allocation5 + $0x80] ss:$8 sps:$4 sm:$0xff]  }
  0x89   : > { %1670 = vmatpush1.bf16.msra.mxu1 %v2956_v23  ;;  %1478 = vmatprep.subr.bf16.mxu0 %v2957_v24  ;;  %v3013_v3 = vld [vmem:[#allocation5 + $0x184] ss:$8 sps:$4 sm:$0xff]   ;;  %v3016_v5 = vld [vmem:[#allocation5 + $0x180] ss:$8 sps:$4 sm:$0xff]   ;;  %v304_v8 = vld [vmem:[%s3611_s23 + $0x10] sm:$0xff]  ;;  %s2800_s13 = sshll.u32 (%p4347_p1), %s3481_s22, 1 }
  0x8a   : > { %1671 = vmatprep.subr.bf16.mxu1 %v2959_v25  ;;  %v312_v9 = vld [vmem:[%s3611_s23 + $0x50] sm:$0xff]  ;;  %v319_v10 = vld [vmem:[%s3611_s23 + $0x88] sm:$0xff]  ;;  %v321_v12 = vld [vmem:[%s3611_s23 + $0x98] sm:$0xff]  ;;  %s2540_s26 = ssub.s32 (%p4347_p1), 3, %s2800_s13 }
  0x8b   : > { %v327_v11 = vld [vmem:[%s3611_s23 + $0xc8] sm:$0xff]  ;;  %v329_v13 = vld [vmem:[%s3611_s23 + $0xd8] sm:$0xff]  ;;  %v560_v15 = vpack.c.bf16 %v312_v9, %v304_v8  ;;  %v318_v18 = vld [vmem:[%s3611_s23 + $0x80] sm:$0xff]  ;;  %p2541_p6 = scmp.lt.s32.totalorder (%p4347_p1), %s2540_s26, 2 }
  0x8c   : > { %1479 = vmatpush1.bf16.msra.mxu0 %v2961_v26  ;;  %v567_v16 = vpack.c.bf16 %v327_v11, %v319_v10  ;;  %v569_v17 = vpack.c.bf16 %v329_v13, %v321_v12  ;;  %v326_v19 = vld [vmem:[%s3611_s23 + $0xc0] sm:$0xff]  ;;  %v320_v20 = vld [vmem:[%s3611_s23 + $0x90] sm:$0xff]  ;;  %v335_v22 = vld [vmem:[%s3611_s23 + $0x108] sm:$0xff] }
  0x8d   : > { %1672 = vmatpush1.bf16.msra.mxu1 %v2962_v27  ;;  %1480 = vmatprep.subr.bf16.mxu0 %v2963_v28  ;;  %v328_v21 = vld [vmem:[%s3611_s23 + $0xd0] sm:$0xff]  ;;  %v343_v23 = vld [vmem:[%s3611_s23 + $0x148] sm:$0xff]  ;;  %v337_v24 = vld [vmem:[%s3611_s23 + $0x118] sm:$0xff] }
  0x8e   : > { %1673 = vmatprep.subr.bf16.mxu1 %v2965_v29  ;;  %v345_v25 = vld [vmem:[%s3611_s23 + $0x158] sm:$0xff]  ;;  %v3047_v6 = vld [vmem:[#allocation5 + $0x220] ss:$8 sps:$4 sm:$0xff]   ;;  %v3049_v7 = vld [vmem:[#allocation5 + $0x224] ss:$8 sps:$4 sm:$0xff]  }
  0x8f   : > { %v3017_v26 = vld [vmem:[#allocation5 + $0x270] ss:$8 sps:$4 sm:$0xff]   ;;  %v3019_v27 = vld [vmem:[#allocation5 + $0x274] ss:$8 sps:$4 sm:$0xff]   ;;  %v3052_v10 = vld [vmem:[#allocation5 + $0x324] ss:$8 sps:$4 sm:$0xff]  }
  0x90   : > { %1481 = vmatpush1.bf16.msra.mxu0 %v2967_v30  ;;  %v3020_v28 = vld [vmem:[#allocation5 + $0x370] ss:$8 sps:$4 sm:$0xff]   ;;  %v3022_v29 = vld [vmem:[#allocation5 + $0x374] ss:$8 sps:$4 sm:$0xff]   ;;  %v3023_v30 = vld [vmem:[#allocation5 + $0x260] ss:$8 sps:$4 sm:$0xff]  }
  0x91   : > { %1674 = vmatpush1.bf16.msra.mxu1 %v2968_v31  ;;  %1482 = vmatprep.subr.bf16.mxu0 %v2969_v32  ;;  %v3025_v31 = vld [vmem:[#allocation5 + $0x264] ss:$8 sps:$4 sm:$0xff]   ;;  %v566_v32 = vpack.c.bf16 %v326_v19, %v318_v18  ;;  %v3029_v46 = vld [vmem:[#allocation5 + $0x250] ss:$8 sps:$4 sm:$0xff]   ;;  %v3031_v47 = vld [vmem:[#allocation5 + $0x254] ss:$8 sps:$4 sm:$0xff]  }
  0x92   : > { %1675 = vmatprep.subr.bf16.mxu1 %v2971_v33  ;;  %v568_v33 = vpack.c.bf16 %v328_v21, %v320_v20  ;;  %v3032_v48 = vld [vmem:[#allocation5 + $0x350] ss:$8 sps:$4 sm:$0xff]   ;;  %v3034_v49 = vld [vmem:[#allocation5 + $0x354] ss:$8 sps:$4 sm:$0xff]   ;;  %v3050_v13 = vld [vmem:[#allocation5 + $0x320] ss:$8 sps:$4 sm:$0xff]  }
  0x93   : > { %v383_v18 = vld [vmem:[%s3611_s23 + $0x288] sm:$0xff]  ;;  %v385_v20 = vld [vmem:[%s3611_s23 + $0x298] sm:$0xff] }
  0x94   : > { %1483 = vmatpush2.bf16.msra.mxu0 %v2973_v34  ;;  %v3028_v34 = vld [vmem:[#allocation5 + $0x364] ss:$8 sps:$4 sm:$0xff]   ;;  %v393_v21 = vld [vmem:[%s3611_s23 + $0x2d8] sm:$0xff] }
  0x95   : > { %1676 = vmatpush2.bf16.msra.mxu1 %v2974_v35  ;;  %1484 = vmatprep.subr.bf16.mxu0 %v2975_v36  ;;  %v575_v35 = vpack.c.bf16 %v343_v23, %v335_v22  ;;  %v577_v36 = vpack.c.bf16 %v345_v25, %v337_v24  ;;  %v391_v19 = vld [vmem:[%s3611_s23 + $0x2c8] sm:$0xff]  ;;  %v3053_v22 = vld [vmem:[#allocation5 + $0x210] ss:$8 sps:$4 sm:$0xff]   ;;  %v3055_v23 = vld [vmem:[#allocation5 + $0x214] ss:$8 sps:$4 sm:$0xff]  }
  0x96   : > { %1677 = vmatprep.subr.bf16.mxu1 %v2977_v37  ;;  %v3026_v37 = vld [vmem:[#allocation5 + $0x360] ss:$8 sps:$4 sm:$0xff]   ;;  %v3056_v24 = vld [vmem:[#allocation5 + $0x310] ss:$8 sps:$4 sm:$0xff]   ;;  %v3058_v25 = vld [vmem:[#allocation5 + $0x314] ss:$8 sps:$4 sm:$0xff]  }
  0x98   : > { %1485 = vmatpush2.bf16.msra.mxu0 %v2979_v38  ;;  %v334_v38 = vld [vmem:[%s3611_s23 + $0x100] sm:$0xff] }
  0x99   : > { %1678 = vmatpush2.bf16.msra.mxu1 %v2980_v39  ;;  %1486 = vmatprep.subr.bf16.mxu0 %v2981_v40  ;;  %v342_v39 = vld [vmem:[%s3611_s23 + $0x140] sm:$0xff]  ;;  %v336_v40 = vld [vmem:[%s3611_s23 + $0x110] sm:$0xff] }
  0x9a   : > { %1679 = vmatprep.subr.bf16.mxu1 %v2983_v41  ;;  %v344_v41 = vld [vmem:[%s3611_s23 + $0x150] sm:$0xff]  ;;  %v574_v52 = vpack.c.bf16 %v342_v39, %v334_v38  ;;  %v399_v38 = vld [vmem:[%s3611_s23 + $0x308] sm:$0xff] }
  0x9b   : > { %v576_v53 = vpack.c.bf16 %v344_v41, %v336_v40  ;;  %v407_v39 = vld [vmem:[%s3611_s23 + $0x348] sm:$0xff]  ;;  %v401_v40 = vld [vmem:[%s3611_s23 + $0x318] sm:$0xff] }
  0x9c   : > { %1487 = vmatpush2.bf16.msra.mxu0 %v2985_v42  ;;  %v351_v42 = vld [vmem:[%s3611_s23 + $0x188] sm:$0xff]  ;;  %v409_v41 = vld [vmem:[%s3611_s23 + $0x358] sm:$0xff] }
  0x9d   : > { %1680 = vmatpush2.bf16.msra.mxu1 %v2986_v43  ;;  %1488 = vmatprep.subr.bf16.mxu0 %v2987_v44  ;;  %v359_v43 = vld [vmem:[%s3611_s23 + $0x1c8] sm:$0xff]  ;;  %v353_v44 = vld [vmem:[%s3611_s23 + $0x198] sm:$0xff] }
  0x9e   : > { %1681 = vmatprep.subr.bf16.mxu1 %v2989_v45  ;;  %v361_v45 = vld [vmem:[%s3611_s23 + $0x1d8] sm:$0xff] }
  0xa0   : > { %1489 = vmatpush2.bf16.msra.mxu0 %v2991_v50  ;;  %v3035_v50 = vld [vmem:[#allocation5 + $0x240] ss:$8 sps:$4 sm:$0xff]  }
  0xa1   : > { %1682 = vmatpush2.bf16.msra.mxu1 %v2992_v51  ;;  %1490 = vmatprep.subr.bf16.mxu0 %v2993_v54  ;;  %v3037_v51 = vld [vmem:[#allocation5 + $0x244] ss:$8 sps:$4 sm:$0xff]  }
  0xa2   : > { %1683 = vmatprep.subr.bf16.mxu1 %v2995_v55  ;;  %v3040_v54 = vld [vmem:[#allocation5 + $0x344] ss:$8 sps:$4 sm:$0xff]   ;;  %v583_v55 = vpack.c.bf16 %v359_v43, %v351_v42  ;;  %v3065_v42 = vld [vmem:[#allocation5 + $0x2f0] ss:$8 sps:$4 sm:$0xff]   ;;  %v3067_v43 = vld [vmem:[#allocation5 + $0x2f4] ss:$8 sps:$4 sm:$0xff]  }
  0xa4   : > { %1491 = vmatpush2.bf16.msra.mxu0 %v2997_v56  ;;  %v585_v56 = vpack.c.bf16 %v361_v45, %v353_v44  ;;  %v3068_v44 = vld [vmem:[#allocation5 + $0x3f0] ss:$8 sps:$4 sm:$0xff]   ;;  %v3070_v45 = vld [vmem:[#allocation5 + $0x3f4] ss:$8 sps:$4 sm:$0xff]  }
  0xa5   : > { %1684 = vmatpush2.bf16.msra.mxu1 %v2998_v57  ;;  %1492 = vmatprep.subr.bf16.mxu0 %v2999_v58  ;;  %v3038_v57 = vld [vmem:[#allocation5 + $0x340] ss:$8 sps:$4 sm:$0xff]  }
  0xa6   : > { %1685 = vmatprep.subr.bf16.mxu1 %v3001_v59  ;;  %v350_v58 = vld [vmem:[%s3611_s23 + $0x180] sm:$0xff] }
  0xa7   : > { %v358_v59 = vld [vmem:[%s3611_s23 + $0x1c0] sm:$0xff] }
  0xa8   : > { %1493 = vmatpush2.bf16.msra.mxu0 %v3003_v60  ;;  %v352_v60 = vld [vmem:[%s3611_s23 + $0x190] sm:$0xff]  ;;  %v582_v8 = vpack.c.bf16 %v358_v59, %v350_v58  ;;  %v415_v58 = vld [vmem:[%s3611_s23 + $0x388] sm:$0xff] }
  0xa9   : > { %1686 = vmatpush2.bf16.msra.mxu1 %v3004_v61  ;;  %1494 = vmatprep.subr.bf16.mxu0 %v3005_v62  ;;  %v360_v61 = vld [vmem:[%s3611_s23 + $0x1d0] sm:$0xff]  ;;  %v367_v62 = vld [vmem:[%s3611_s23 + $0x208] sm:$0xff] }
  0xaa   : > { %1687 = vmatprep.subr.bf16.mxu1 %v3007_v63  ;;  %v375_v63 = vld [vmem:[%s3611_s23 + $0x248] sm:$0xff]  ;;  %v584_v9 = vpack.c.bf16 %v360_v61, %v352_v60  ;;  %v417_v60 = vld [vmem:[%s3611_s23 + $0x398] sm:$0xff] }
  0xab   : > { %v591_v11 = vpack.c.bf16 %v375_v63, %v367_v62  ;;  %v423_v59 = vld [vmem:[%s3611_s23 + $0x3c8] sm:$0xff]  ;;  %v425_v61 = vld [vmem:[%s3611_s23 + $0x3d8] sm:$0xff] }
  0xac   : > { %1495 = vmatpush2.bf16.msra.mxu0 %v3009_v0  ;;  %v369_v0 = vld [vmem:[%s3611_s23 + $0x218] sm:$0xff] }
  0xad   : > { %1688 = vmatpush2.bf16.msra.mxu1 %v3010_v1  ;;  %1496 = vmatprep.subr.bf16.mxu0 %v3011_v2  ;;  %v377_v1 = vld [vmem:[%s3611_s23 + $0x258] sm:$0xff] }
  0xae   : > { %1689 = vmatprep.subr.bf16.mxu1 %v3013_v3  ;;  %v3041_v2 = vld [vmem:[#allocation5 + $0x230] ss:$8 sps:$4 sm:$0xff]   ;;  %v3043_v3 = vld [vmem:[#allocation5 + $0x234] ss:$8 sps:$4 sm:$0xff]   ;;  %v593_v12 = vpack.c.bf16 %v377_v1, %v369_v0 }
  0xaf   : > { %v3077_v62 = vld [vmem:[#allocation5 + $0x2d0] ss:$8 sps:$4 sm:$0xff]   ;;  %v3079_v63 = vld [vmem:[#allocation5 + $0x2d4] ss:$8 sps:$4 sm:$0xff]  }
  0xb0   : > { %1497 = vmatpush2.bf16.msra.mxu0 %v3015_v4  ;;  %v3044_v4 = vld [vmem:[#allocation5 + $0x330] ss:$8 sps:$4 sm:$0xff]   ;;  %v3082_v1 = vld [vmem:[#allocation5 + $0x3d4] ss:$8 sps:$4 sm:$0xff]  }
  0xb1   : > { %1690 = vmatpush2.bf16.msra.mxu1 %v3016_v5  ;;  %1852 = vmatprep.subr.bf16.mxu0 %v3019_v27  ;;  %v3046_v5 = vld [vmem:[#allocation5 + $0x334] ss:$8 sps:$4 sm:$0xff]   ;;  %v3061_v27 = vld [vmem:[#allocation5 + $0x204] ss:$8 sps:$4 sm:$0xff]   ;;  %v3080_v0 = vld [vmem:[#allocation5 + $0x3d0] ss:$8 sps:$4 sm:$0xff]  }
  0xb2   : > { %2045 = vmatprep.subr.bf16.mxu1 %v3022_v29 }
  0xb3   : > { %1499 = vmatmul.mubr.bf16.vlgmr.msra.gmra.mxu0 %v558_v14  ;;  %v366_v14 = vld [vmem:[%s3611_s23 + $0x200] sm:$0xff] }
  0xb4   : > { %1692 = vmatmul.mubr.bf16.vlgmr.msra.gmra.mxu1 %v560_v15  ;;  %1508 = vmatprep.mubr.bf16.mxu0 %v567_v16  ;;  %v374_v15 = vld [vmem:[%s3611_s23 + $0x240] sm:$0xff]  ;;  %v368_v16 = vld [vmem:[%s3611_s23 + $0x210] sm:$0xff] }
  0xb5   : > { %1701 = vmatprep.mubr.bf16.mxu1 %v569_v17  ;;  %1853 = vmatpush1.bf16.msra.mxu0 %v3017_v26  ;;  %v376_v17 = vld [vmem:[%s3611_s23 + $0x250] sm:$0xff]  ;;  %v3059_v26 = vld [vmem:[#allocation5 + $0x200] ss:$8 sps:$4 sm:$0xff]  }
  0xb6   : > { %2046 = vmatpush1.bf16.msra.mxu1 %v3020_v28  ;;  %1854 = vmatprep.subr.bf16.mxu0 %v3025_v31  ;;  %v590_v28 = vpack.c.bf16 %v374_v15, %v366_v14  ;;  %v592_v29 = vpack.c.bf16 %v376_v17, %v368_v16  ;;  %v599_v31 = vpack.c.bf16 %v391_v19, %v383_v18  ;;  %v431_v14 = vld [vmem:[%s3611_s23 + $0x408] sm:$0xff]  ;;  %v433_v16 = vld [vmem:[%s3611_s23 + $0x418] sm:$0xff] }
  0xb7   : > { %2047 = vmatprep.subr.bf16.mxu1 %v3028_v34  ;;  %v382_v34 = vld [vmem:[%s3611_s23 + $0x280] sm:$0xff]  ;;  %v439_v15 = vld [vmem:[%s3611_s23 + $0x448] sm:$0xff]  ;;  %v441_v17 = vld [vmem:[%s3611_s23 + $0x458] sm:$0xff] }
  0xb8   : > { %v3089_v18 = vld [vmem:[#allocation5 + $0x2b0] ss:$8 sps:$4 sm:$0xff]   ;;  %v3091_v19 = vld [vmem:[#allocation5 + $0x2b4] ss:$8 sps:$4 sm:$0xff]  }
  0xb9   : > { %1855 = vmatpush1.bf16.msra.mxu0 %v3023_v30  ;;  %v3064_v30 = vld [vmem:[#allocation5 + $0x304] ss:$8 sps:$4 sm:$0xff]  }
  0xba   : > { %2048 = vmatpush1.bf16.msra.mxu1 %v3026_v37  ;;  %1856 = vmatprep.subr.bf16.mxu0 %v3031_v47  ;;  %v392_v37 = vld [vmem:[%s3611_s23 + $0x2d0] sm:$0xff]  ;;  %v3073_v47 = vld [vmem:[#allocation5 + $0x2e4] ss:$8 sps:$4 sm:$0xff]  }
  0xbb   : > { %1509 = vmatmul.mubr.bf16.gmra.mxu0 %v566_v32  ;;  %2049 = vmatprep.subr.bf16.mxu1 %v3034_v49  ;;  %v601_v32 = vpack.c.bf16 %v393_v21, %v385_v20  ;;  %v3092_v20 = vld [vmem:[#allocation5 + $0x3b0] ss:$8 sps:$4 sm:$0xff]   ;;  %v3094_v21 = vld [vmem:[#allocation5 + $0x3b4] ss:$8 sps:$4 sm:$0xff]  }
  0xbc   : > { %1702 = vmatmul.mubr.bf16.gmra.mxu1 %v568_v33  ;;  %1518 = vmatprep.mubr.bf16.mxu0 %v575_v35  ;;  %v3062_v33 = vld [vmem:[#allocation5 + $0x300] ss:$8 sps:$4 sm:$0xff]  }
  0xbd   : > { %1711 = vmatprep.mubr.bf16.mxu1 %v577_v36  ;;  %1857 = vmatpush1.bf16.msra.mxu0 %v3029_v46  ;;  %v390_v35 = vld [vmem:[%s3611_s23 + $0x2c0] sm:$0xff]  ;;  %v384_v36 = vld [vmem:[%s3611_s23 + $0x290] sm:$0xff] }
  0xbe   : > { %1858 = vmatprep.subr.bf16.mxu0 %v3037_v51  ;;  %2050 = vmatpush1.bf16.msra.mxu1 %v3032_v48  ;;  %v3071_v46 = vld [vmem:[#allocation5 + $0x2e0] ss:$8 sps:$4 sm:$0xff]   ;;  %v598_v48 = vpack.c.bf16 %v390_v35, %v382_v34  ;;  %v600_v49 = vpack.c.bf16 %v392_v37, %v384_v36  ;;  %v607_v51 = vpack.c.bf16 %v407_v39, %v399_v38  ;;  %v449_v36 = vld [vmem:[%s3611_s23 + $0x498] sm:$0xff] }
  0xbf   : > { %2051 = vmatprep.subr.bf16.mxu1 %v3040_v54  ;;  %v398_v54 = vld [vmem:[%s3611_s23 + $0x300] sm:$0xff]  ;;  %v447_v34 = vld [vmem:[%s3611_s23 + $0x488] sm:$0xff]  ;;  %v457_v37 = vld [vmem:[%s3611_s23 + $0x4d8] sm:$0xff] }
  0xc0   : > { %v455_v35 = vld [vmem:[%s3611_s23 + $0x4c8] sm:$0xff]  ;;  %v3101_v38 = vld [vmem:[#allocation5 + $0x290] ss:$8 sps:$4 sm:$0xff]   ;;  %v3103_v39 = vld [vmem:[#allocation5 + $0x294] ss:$8 sps:$4 sm:$0xff]  }
  0xc1   : > { %1859 = vmatpush1.bf16.msra.mxu0 %v3035_v50  ;;  %v3076_v50 = vld [vmem:[#allocation5 + $0x3e4] ss:$8 sps:$4 sm:$0xff]  }
  0xc2   : > { %2052 = vmatpush1.bf16.msra.mxu1 %v3038_v57  ;;  %1860 = vmatprep.subr.bf16.mxu0 %v3043_v3  ;;  %v408_v57 = vld [vmem:[%s3611_s23 + $0x350] sm:$0xff]  ;;  %v3085_v3 = vld [vmem:[#allocation5 + $0x2c4] ss:$8 sps:$4 sm:$0xff]  }
  0xc3   : > { %1519 = vmatmul.mubr.bf16.gmra.mxu0 %v574_v52  ;;  %2053 = vmatprep.subr.bf16.mxu1 %v3046_v5  ;;  %v609_v52 = vpack.c.bf16 %v409_v41, %v401_v40  ;;  %v3104_v40 = vld [vmem:[#allocation5 + $0x390] ss:$8 sps:$4 sm:$0xff]   ;;  %v3106_v41 = vld [vmem:[#allocation5 + $0x394] ss:$8 sps:$4 sm:$0xff]  }
  0xc4   : > { %1712 = vmatmul.mubr.bf16.gmra.mxu1 %v576_v53  ;;  %1528 = vmatprep.mubr.bf16.mxu0 %v583_v55  ;;  %v3074_v53 = vld [vmem:[#allocation5 + $0x3e0] ss:$8 sps:$4 sm:$0xff]  }
  0xc5   : > { %1721 = vmatprep.mubr.bf16.mxu1 %v585_v56  ;;  %1861 = vmatpush1.bf16.msra.mxu0 %v3041_v2  ;;  %v406_v55 = vld [vmem:[%s3611_s23 + $0x340] sm:$0xff]  ;;  %v400_v56 = vld [vmem:[%s3611_s23 + $0x310] sm:$0xff] }
  0xc6   : > { %1862 = vmatprep.subr.bf16.mxu0 %v3049_v7  ;;  %2054 = vmatpush1.bf16.msra.mxu1 %v3044_v4  ;;  %v3083_v2 = vld [vmem:[#allocation5 + $0x2c0] ss:$8 sps:$4 sm:$0xff]   ;;  %v606_v4 = vpack.c.bf16 %v406_v55, %v398_v54  ;;  %v608_v5 = vpack.c.bf16 %v408_v57, %v400_v56  ;;  %v615_v7 = vpack.c.bf16 %v423_v59, %v415_v58  ;;  %v465_v56 = vld [vmem:[%s3611_s23 + $0x518] sm:$0xff] }
  0xc7   : > { %2055 = vmatprep.subr.bf16.mxu1 %v3052_v10  ;;  %v414_v10 = vld [vmem:[%s3611_s23 + $0x380] sm:$0xff]  ;;  %v463_v54 = vld [vmem:[%s3611_s23 + $0x508] sm:$0xff]  ;;  %v473_v57 = vld [vmem:[%s3611_s23 + $0x558] sm:$0xff] }
  0xc8   : > { %v471_v55 = vld [vmem:[%s3611_s23 + $0x548] sm:$0xff] }
  0xc9   : > { %1863 = vmatpush1.bf16.msra.mxu0 %v3047_v6  ;;  %v3088_v6 = vld [vmem:[#allocation5 + $0x3c4] ss:$8 sps:$4 sm:$0xff]  }
  0xca   : > { %2056 = vmatpush1.bf16.msra.mxu1 %v3050_v13  ;;  %1864 = vmatprep.subr.bf16.mxu0 %v3055_v23  ;;  %v424_v13 = vld [vmem:[%s3611_s23 + $0x3d0] sm:$0xff]  ;;  %v3097_v23 = vld [vmem:[#allocation5 + $0x2a4] ss:$8 sps:$4 sm:$0xff]  }
  0xcb   : > { %1529 = vmatmul.mubr.bf16.gmra.mxu0 %v582_v8  ;;  %2057 = vmatprep.subr.bf16.mxu1 %v3058_v25  ;;  %v617_v8 = vpack.c.bf16 %v425_v61, %v417_v60  ;;  %v639_v60 = vpack.c.bf16 %v471_v55, %v463_v54  ;;  %v641_v61 = vpack.c.bf16 %v473_v57, %v465_v56 }
  0xcc   : > { %1722 = vmatmul.mubr.bf16.gmra.mxu1 %v584_v9  ;;  %1538 = vmatprep.mubr.bf16.mxu0 %v591_v11  ;;  %v3086_v9 = vld [vmem:[#allocation5 + $0x3c0] ss:$8 sps:$4 sm:$0xff]  }
  0xcd   : > { %1731 = vmatprep.mubr.bf16.mxu1 %v593_v12  ;;  %1865 = vmatpush1.bf16.msra.mxu0 %v3053_v22  ;;  %v422_v11 = vld [vmem:[%s3611_s23 + $0x3c0] sm:$0xff]  ;;  %v416_v12 = vld [vmem:[%s3611_s23 + $0x390] sm:$0xff] }
  0xce   : > { %1866 = vmatprep.subr.bf16.mxu0 %v3061_v27  ;;  %2058 = vmatpush1.bf16.msra.mxu1 %v3056_v24  ;;  %v3095_v22 = vld [vmem:[#allocation5 + $0x2a0] ss:$8 sps:$4 sm:$0xff]   ;;  %v614_v24 = vpack.c.bf16 %v422_v11, %v414_v10  ;;  %v616_v25 = vpack.c.bf16 %v424_v13, %v416_v12  ;;  %v623_v27 = vpack.c.bf16 %v439_v15, %v431_v14  ;;  %v480_v12 = vld [vmem:[%s3611_s23 + $0x590] sm:$0xff] }
  0xcf   : > { %2059 = vmatprep.subr.bf16.mxu1 %v3064_v30  ;;  %v430_v30 = vld [vmem:[%s3611_s23 + $0x400] sm:$0xff]  ;;  %v488_v13 = vld [vmem:[%s3611_s23 + $0x5d0] sm:$0xff]  ;;  %v495_v14 = vld [vmem:[%s3611_s23 + $0x608] sm:$0xff] }
  0xd0   : > { %v478_v10 = vld [vmem:[%s3611_s23 + $0x580] sm:$0xff]  ;;  %v503_v15 = vld [vmem:[%s3611_s23 + $0x648] sm:$0xff] }
  0xd1   : > { %1867 = vmatpush1.bf16.msra.mxu0 %v3059_v26  ;;  %v3100_v26 = vld [vmem:[#allocation5 + $0x3a4] ss:$8 sps:$4 sm:$0xff]  }
  0xd2   : > { %2060 = vmatpush1.bf16.msra.mxu1 %v3062_v33  ;;  %1868 = vmatprep.subr.bf16.mxu0 %v3067_v43  ;;  %v440_v33 = vld [vmem:[%s3611_s23 + $0x450] sm:$0xff]  ;;  %v3109_v43 = vld [vmem:[#allocation5 + $0x284] ss:$8 sps:$4 sm:$0xff]  }
  0xd3   : > { %1539 = vmatmul.mubr.bf16.gmra.mxu0 %v590_v28  ;;  %2061 = vmatprep.subr.bf16.mxu1 %v3070_v45  ;;  %v625_v28 = vpack.c.bf16 %v441_v17, %v433_v16  ;;  %v486_v11 = vld [vmem:[%s3611_s23 + $0x5c0] sm:$0xff]  ;;  %v497_v16 = vld [vmem:[%s3611_s23 + $0x618] sm:$0xff] }
  0xd4   : > { %1732 = vmatmul.mubr.bf16.gmra.mxu1 %v592_v29  ;;  %1548 = vmatprep.mubr.bf16.mxu0 %v599_v31  ;;  %v3098_v29 = vld [vmem:[#allocation5 + $0x3a0] ss:$8 sps:$4 sm:$0xff]   ;;  %v505_v17 = vld [vmem:[%s3611_s23 + $0x658] sm:$0xff] }
  0xd5   : > { %1741 = vmatprep.mubr.bf16.mxu1 %v601_v32  ;;  %1869 = vmatpush2.bf16.msra.mxu0 %v3065_v42  ;;  %v438_v31 = vld [vmem:[%s3611_s23 + $0x440] sm:$0xff]  ;;  %v432_v32 = vld [vmem:[%s3611_s23 + $0x410] sm:$0xff] }
  0xd6   : > { %1870 = vmatprep.subr.bf16.mxu0 %v3073_v47  ;;  %2062 = vmatpush2.bf16.msra.mxu1 %v3068_v44  ;;  %v3107_v42 = vld [vmem:[#allocation5 + $0x280] ss:$8 sps:$4 sm:$0xff]   ;;  %v622_v44 = vpack.c.bf16 %v438_v31, %v430_v30  ;;  %v624_v45 = vpack.c.bf16 %v440_v33, %v432_v32  ;;  %v631_v47 = vpack.c.bf16 %v455_v35, %v447_v34 }
  0xd7   : > { %2063 = vmatprep.subr.bf16.mxu1 %v3076_v50  ;;  %v446_v50 = vld [vmem:[%s3611_s23 + $0x480] sm:$0xff] }
  0xd8   : > { %v510_v34 = vld [vmem:[%s3611_s23 + $0x680] sm:$0xff] }
  0xd9   : > { %1871 = vmatpush2.bf16.msra.mxu0 %v3071_v46  ;;  %v3112_v46 = vld [vmem:[#allocation5 + $0x384] ss:$8 sps:$4 sm:$0xff]  }
  0xda   : > { %2064 = vmatpush2.bf16.msra.mxu1 %v3074_v53  ;;  %1872 = vmatprep.subr.bf16.mxu0 %v3079_v63  ;;  %v456_v53 = vld [vmem:[%s3611_s23 + $0x4d0] sm:$0xff]  ;;  %v470_v63 = vld [vmem:[%s3611_s23 + $0x540] sm:$0xff] }
  0xdb   : > { %1549 = vmatmul.mubr.bf16.gmra.mxu0 %v598_v48  ;;  %2065 = vmatprep.subr.bf16.mxu1 %v3082_v1  ;;  %v633_v48 = vpack.c.bf16 %v457_v37, %v449_v36  ;;  %v472_v1 = vld [vmem:[%s3611_s23 + $0x550] sm:$0xff]  ;;  %v518_v35 = vld [vmem:[%s3611_s23 + $0x6c0] sm:$0xff] }
  0xdc   : > { %1742 = vmatmul.mubr.bf16.gmra.mxu1 %v600_v49  ;;  %1558 = vmatprep.mubr.bf16.mxu0 %v607_v51  ;;  %v3110_v49 = vld [vmem:[#allocation5 + $0x380] ss:$8 sps:$4 sm:$0xff]   ;;  %v512_v36 = vld [vmem:[%s3611_s23 + $0x690] sm:$0xff] }
  0xdd   : > { %1751 = vmatprep.mubr.bf16.mxu1 %v609_v52  ;;  %1873 = vmatpush2.bf16.msra.mxu0 %v3077_v62  ;;  %v454_v51 = vld [vmem:[%s3611_s23 + $0x4c0] sm:$0xff]  ;;  %v448_v52 = vld [vmem:[%s3611_s23 + $0x490] sm:$0xff] }
  0xde   : > { %1874 = vmatprep.subr.bf16.mxu0 %v3085_v3  ;;  %2066 = vmatpush2.bf16.msra.mxu1 %v3080_v0  ;;  %v630_v58 = vpack.c.bf16 %v454_v51, %v446_v50  ;;  %v632_v59 = vpack.c.bf16 %v456_v53, %v448_v52  ;;  %v462_v62 = vld [vmem:[%s3611_s23 + $0x500] sm:$0xff]  ;;  %v464_v0 = vld [vmem:[%s3611_s23 + $0x510] sm:$0xff]  ;;  %v487_v3 = vld [vmem:[%s3611_s23 + $0x5c8] sm:$0xff] }
  0xdf   : > { %2067 = vmatprep.subr.bf16.mxu1 %v3088_v6  ;;  %v638_v6 = vpack.c.bf16 %v470_v63, %v462_v62  ;;  %v520_v37 = vld [vmem:[%s3611_s23 + $0x6d0] sm:$0xff]  ;;  %v543_v50 = vld [vmem:[%s3611_s23 + $0x788] sm:$0xff]  ;;  %v545_v52 = vld [vmem:[%s3611_s23 + $0x798] sm:$0xff] }
  0xe0   : > { %v551_v51 = vld [vmem:[%s3611_s23 + $0x7c8] sm:$0xff]  ;;  %v553_v53 = vld [vmem:[%s3611_s23 + $0x7d8] sm:$0xff] }
  0xe1   : > { %1875 = vmatpush2.bf16.msra.mxu0 %v3083_v2  ;;  %v479_v2 = vld [vmem:[%s3611_s23 + $0x588] sm:$0xff]  ;;  %v679_v56 = vpack.c.bf16 %v551_v51, %v543_v50  ;;  %v681_v57 = vpack.c.bf16 %v553_v53, %v545_v52 }
  0xe2   : > { %2068 = vmatpush2.bf16.msra.mxu1 %v3086_v9  ;;  %1876 = vmatprep.subr.bf16.mxu0 %v3091_v19  ;;  %v648_v19 = vpack.c.bf16 %v488_v13, %v480_v12  ;;  %v307_v62 = vld [vmem:[%s3611_s23 + $0x28] sm:$0xff]  ;;  %v325_v12 = vld [vmem:[%s3611_s23 + $0xb8] sm:$0xff] }
  0xe3   : > { %1559 = vmatmul.mubr.bf16.gmra.mxu0 %v606_v4  ;;  %2069 = vmatprep.subr.bf16.mxu1 %v3094_v21  ;;  %v481_v4 = vld [vmem:[%s3611_s23 + $0x598] sm:$0xff]  ;;  %v657_v21 = vpack.c.bf16 %v505_v17, %v497_v16  ;;  %v315_v63 = vld [vmem:[%s3611_s23 + $0x68] sm:$0xff] }
  0xe4   : > { %1752 = vmatmul.mubr.bf16.gmra.mxu1 %v608_v5  ;;  %1568 = vmatprep.mubr.bf16.mxu0 %v615_v7  ;;  %v489_v5 = vld [vmem:[%s3611_s23 + $0x5d8] sm:$0xff]  ;;  %v640_v7 = vpack.c.bf16 %v472_v1, %v464_v0 }
  0xe5   : > { %1761 = vmatprep.mubr.bf16.mxu1 %v617_v8  ;;  %1877 = vmatpush2.bf16.msra.mxu0 %v3089_v18  ;;  %v647_v8 = vpack.c.bf16 %v487_v3, %v479_v2  ;;  %v649_v9 = vpack.c.bf16 %v489_v5, %v481_v4  ;;  %v646_v18 = vpack.c.bf16 %v486_v11, %v478_v10  ;;  %v309_v0 = vld [vmem:[%s3611_s23 + $0x38] sm:$0xff]  ;;  %v323_v10 = vld [vmem:[%s3611_s23 + $0xa8] sm:$0xff] }
  0xe6   : > { %1878 = vmatprep.subr.bf16.mxu0 %v3097_v23  ;;  %2070 = vmatpush2.bf16.msra.mxu1 %v3092_v20  ;;  %v655_v20 = vpack.c.bf16 %v503_v15, %v495_v14  ;;  %v502_v23 = vld [vmem:[%s3611_s23 + $0x640] sm:$0xff]  ;;  %v317_v1 = vld [vmem:[%s3611_s23 + $0x78] sm:$0xff]  ;;  %v563_v4 = vpack.c.bf16 %v315_v63, %v307_v62  ;;  %v331_v11 = vld [vmem:[%s3611_s23 + $0xe8] sm:$0xff] }
  0xe7   : > { %2071 = vmatprep.subr.bf16.mxu1 %v3100_v26  ;;  %v511_v26 = vld [vmem:[%s3611_s23 + $0x688] sm:$0xff]  ;;  %v565_v5 = vpack.c.bf16 %v317_v1, %v309_v0  ;;  %v333_v13 = vld [vmem:[%s3611_s23 + $0xf8] sm:$0xff]  ;;  %v571_v16 = vpack.c.bf16 %v331_v11, %v323_v10 }
  0xe8   : > { %v573_v17 = vpack.c.bf16 %v333_v13, %v325_v12 }
  0xe9   : > { %1879 = vmatpush2.bf16.msra.mxu0 %v3095_v22  ;;  %v494_v22 = vld [vmem:[%s3611_s23 + $0x600] sm:$0xff] }
  0xea   : > { %2072 = vmatpush2.bf16.msra.mxu1 %v3098_v29  ;;  %1880 = vmatprep.subr.bf16.mxu0 %v3103_v39  ;;  %v521_v29 = vld [vmem:[%s3611_s23 + $0x6d8] sm:$0xff]  ;;  %v654_v30 = vpack.c.bf16 %v502_v23, %v494_v22  ;;  %v535_v39 = vld [vmem:[%s3611_s23 + $0x748] sm:$0xff] }
  0xeb   : > { %1569 = vmatmul.mubr.bf16.gmra.mxu0 %v614_v24  ;;  %2073 = vmatprep.subr.bf16.mxu1 %v3106_v41  ;;  %v496_v24 = vld [vmem:[%s3611_s23 + $0x610] sm:$0xff]  ;;  %v537_v41 = vld [vmem:[%s3611_s23 + $0x758] sm:$0xff]  ;;  %v339_v22 = vld [vmem:[%s3611_s23 + $0x128] sm:$0xff] }
  0xec   : > { %1762 = vmatmul.mubr.bf16.gmra.mxu1 %v616_v25  ;;  %1578 = vmatprep.mubr.bf16.mxu0 %v623_v27  ;;  %v504_v25 = vld [vmem:[%s3611_s23 + $0x650] sm:$0xff]  ;;  %v519_v27 = vld [vmem:[%s3611_s23 + $0x6c8] sm:$0xff] }
  0xed   : > { %1771 = vmatprep.mubr.bf16.mxu1 %v625_v28  ;;  %1881 = vmatpush2.bf16.msra.mxu0 %v3101_v38  ;;  %v513_v28 = vld [vmem:[%s3611_s23 + $0x698] sm:$0xff]  ;;  %v656_v31 = vpack.c.bf16 %v504_v25, %v496_v24  ;;  %v663_v32 = vpack.c.bf16 %v519_v27, %v511_v26  ;;  %v527_v38 = vld [vmem:[%s3611_s23 + $0x708] sm:$0xff] }
  0xee   : > { %1882 = vmatprep.subr.bf16.mxu0 %v3109_v43  ;;  %2074 = vmatpush2.bf16.msra.mxu1 %v3104_v40  ;;  %v665_v33 = vpack.c.bf16 %v521_v29, %v513_v28  ;;  %v529_v40 = vld [vmem:[%s3611_s23 + $0x718] sm:$0xff]  ;;  %v664_v43 = vpack.c.bf16 %v520_v37, %v512_v36  ;;  %v347_v23 = vld [vmem:[%s3611_s23 + $0x168] sm:$0xff] }
  0xef   : > { %2075 = vmatprep.subr.bf16.mxu1 %v3112_v46  ;;  %v526_v46 = vld [vmem:[%s3611_s23 + $0x700] sm:$0xff]  ;;  %v341_v24 = vld [vmem:[%s3611_s23 + $0x138] sm:$0xff]  ;;  %v579_v28 = vpack.c.bf16 %v347_v23, %v339_v22 }
  0xf0   : > { %v349_v25 = vld [vmem:[%s3611_s23 + $0x178] sm:$0xff] }
  0xf1   : > { %1883 = vmatpush2.bf16.msra.mxu0 %v3107_v42  ;;  %v662_v42 = vpack.c.bf16 %v518_v35, %v510_v34  ;;  %v581_v29 = vpack.c.bf16 %v349_v25, %v341_v24  ;;  %v355_v34 = vld [vmem:[%s3611_s23 + $0x1a8] sm:$0xff]  ;;  %v357_v36 = vld [vmem:[%s3611_s23 + $0x1b8] sm:$0xff] }
  0xf2   : > { %2076 = vmatpush2.bf16.msra.mxu1 %v3110_v49  ;;  %v536_v49 = vld [vmem:[%s3611_s23 + $0x750] sm:$0xff]  ;;  %v363_v35 = vld [vmem:[%s3611_s23 + $0x1e8] sm:$0xff]  ;;  %v365_v37 = vld [vmem:[%s3611_s23 + $0x1f8] sm:$0xff] }
  0xf3   : > { %1579 = vmatmul.mubr.bf16.gmra.mxu0 %v622_v44  ;;  %v671_v44 = vpack.c.bf16 %v535_v39, %v527_v38 }
  0xf4   : > { %1772 = vmatmul.mubr.bf16.gmra.mxu1 %v624_v45  ;;  %1588 = vmatprep.mubr.bf16.mxu0 %v631_v47  ;;  %v673_v45 = vpack.c.bf16 %v537_v41, %v529_v40  ;;  %v534_v47 = vld [vmem:[%s3611_s23 + $0x740] sm:$0xff]  ;;  %v587_v40 = vpack.c.bf16 %v363_v35, %v355_v34  ;;  %v589_v41 = vpack.c.bf16 %v365_v37, %v357_v36  ;;  %v445_v34 = vld [vmem:[%s3611_s23 + $0x478] sm:$0xff] }
  0xf5   : > { %1781 = vmatprep.mubr.bf16.mxu1 %v633_v48  ;;  %v528_v48 = vld [vmem:[%s3611_s23 + $0x710] sm:$0xff]  ;;  %v670_v54 = vpack.c.bf16 %v534_v47, %v526_v46  ;;  %v371_v46 = vld [vmem:[%s3611_s23 + $0x228] sm:$0xff] }
  0xf6   : > { %v672_v55 = vpack.c.bf16 %v536_v49, %v528_v48  ;;  %v379_v47 = vld [vmem:[%s3611_s23 + $0x268] sm:$0xff]  ;;  %v373_v48 = vld [vmem:[%s3611_s23 + $0x238] sm:$0xff] }
  0xf7   : > { %v381_v49 = vld [vmem:[%s3611_s23 + $0x278] sm:$0xff]  ;;  %v595_v52 = vpack.c.bf16 %v379_v47, %v371_v46  ;;  %v451_v46 = vld [vmem:[%s3611_s23 + $0x4a8] sm:$0xff] }
  0xf8   : > { %v597_v53 = vpack.c.bf16 %v381_v49, %v373_v48  ;;  %v459_v47 = vld [vmem:[%s3611_s23 + $0x4e8] sm:$0xff]  ;;  %v453_v48 = vld [vmem:[%s3611_s23 + $0x4b8] sm:$0xff] }
  0xf9   : > { %v461_v49 = vld [vmem:[%s3611_s23 + $0x4f8] sm:$0xff] }
  0xfb   : > { %1589 = vmatmul.mubr.bf16.gmra.mxu0 %v630_v58  ;;  %v542_v58 = vld [vmem:[%s3611_s23 + $0x780] sm:$0xff] }
  0xfc   : > { %1782 = vmatmul.mubr.bf16.gmra.mxu1 %v632_v59  ;;  %1598 = vmatprep.mubr.bf16.mxu0 %v639_v60  ;;  %v550_v59 = vld [vmem:[%s3611_s23 + $0x7c0] sm:$0xff]  ;;  %v544_v60 = vld [vmem:[%s3611_s23 + $0x790] sm:$0xff] }
  0xfd   : > { %1791 = vmatprep.mubr.bf16.mxu1 %v641_v61  ;;  %v552_v61 = vld [vmem:[%s3611_s23 + $0x7d0] sm:$0xff]  ;;  %v678_v2 = vpack.c.bf16 %v550_v59, %v542_v58  ;;  %v387_v58 = vld [vmem:[%s3611_s23 + $0x2a8] sm:$0xff] }
  0xfe   : > { %v680_v3 = vpack.c.bf16 %v552_v61, %v544_v60  ;;  %v395_v59 = vld [vmem:[%s3611_s23 + $0x2e8] sm:$0xff]  ;;  %v389_v60 = vld [vmem:[%s3611_s23 + $0x2b8] sm:$0xff] }
  0xff   : > { %v397_v61 = vld [vmem:[%s3611_s23 + $0x2f8] sm:$0xff]  ;;  %v603_v0 = vpack.c.bf16 %v395_v59, %v387_v58  ;;  %v450_v59 = vld [vmem:[%s3611_s23 + $0x4a0] sm:$0xff] }
 0x100   : > { %v605_v1 = vpack.c.bf16 %v397_v61, %v389_v60  ;;  %v458_v60 = vld [vmem:[%s3611_s23 + $0x4e0] sm:$0xff] }
 0x103   : > { %1599 = vmatmul.mubr.bf16.gmra.mxu0 %v638_v6  ;;  %v306_v6 = vld [vmem:[%s3611_s23 + $0x20] sm:$0xff] }
 0x104   : > { %1792 = vmatmul.mubr.bf16.gmra.mxu1 %v640_v7  ;;  %1608 = vmatprep.mubr.bf16.mxu0 %v647_v8  ;;  %v314_v7 = vld [vmem:[%s3611_s23 + $0x60] sm:$0xff]  ;;  %v308_v8 = vld [vmem:[%s3611_s23 + $0x30] sm:$0xff] }
 0x105   : > { %1801 = vmatprep.mubr.bf16.mxu1 %v649_v9  ;;  %v316_v9 = vld [vmem:[%s3611_s23 + $0x70] sm:$0xff]  ;;  %v562_v14 = vpack.c.bf16 %v314_v7, %v306_v6  ;;  %v403_v6 = vld [vmem:[%s3611_s23 + $0x328] sm:$0xff] }
 0x106   : > { %v564_v15 = vpack.c.bf16 %v316_v9, %v308_v8  ;;  %v411_v7 = vld [vmem:[%s3611_s23 + $0x368] sm:$0xff]  ;;  %v405_v8 = vld [vmem:[%s3611_s23 + $0x338] sm:$0xff] }
 0x107   : > { %v413_v9 = vld [vmem:[%s3611_s23 + $0x378] sm:$0xff]  ;;  %v611_v12 = vpack.c.bf16 %v411_v7, %v403_v6 }
 0x108   : > { %v613_v13 = vpack.c.bf16 %v413_v9, %v405_v8 }
 0x10b   : > { %1609 = vmatmul.mubr.bf16.gmra.mxu0 %v646_v18  ;;  %v322_v18 = vld [vmem:[%s3611_s23 + $0xa0] sm:$0xff] }
 0x10c   : > { %1802 = vmatmul.mubr.bf16.gmra.mxu1 %v648_v19  ;;  %1618 = vmatprep.mubr.bf16.mxu0 %v655_v20  ;;  %v330_v19 = vld [vmem:[%s3611_s23 + $0xe0] sm:$0xff]  ;;  %v324_v20 = vld [vmem:[%s3611_s23 + $0xb0] sm:$0xff] }
 0x10d   : > { %1811 = vmatprep.mubr.bf16.mxu1 %v657_v21  ;;  %v332_v21 = vld [vmem:[%s3611_s23 + $0xf0] sm:$0xff]  ;;  %v570_v26 = vpack.c.bf16 %v330_v19, %v322_v18  ;;  %v419_v18 = vld [vmem:[%s3611_s23 + $0x3a8] sm:$0xff] }
 0x10e   : > { %v572_v27 = vpack.c.bf16 %v332_v21, %v324_v20  ;;  %v427_v19 = vld [vmem:[%s3611_s23 + $0x3e8] sm:$0xff]  ;;  %v421_v20 = vld [vmem:[%s3611_s23 + $0x3b8] sm:$0xff] }
 0x10f   : > { %v429_v21 = vld [vmem:[%s3611_s23 + $0x3f8] sm:$0xff]  ;;  %v619_v24 = vpack.c.bf16 %v427_v19, %v419_v18 }
 0x110   : > { %v621_v25 = vpack.c.bf16 %v429_v21, %v421_v20 }
 0x113   : > { %1619 = vmatmul.mubr.bf16.gmra.mxu0 %v654_v30  ;;  %v338_v30 = vld [vmem:[%s3611_s23 + $0x120] sm:$0xff] }
 0x114   : > { %1812 = vmatmul.mubr.bf16.gmra.mxu1 %v656_v31  ;;  %1628 = vmatprep.mubr.bf16.mxu0 %v663_v32  ;;  %v346_v31 = vld [vmem:[%s3611_s23 + $0x160] sm:$0xff]  ;;  %v340_v32 = vld [vmem:[%s3611_s23 + $0x130] sm:$0xff] }
 0x115   : > { %1821 = vmatprep.mubr.bf16.mxu1 %v665_v33  ;;  %v348_v33 = vld [vmem:[%s3611_s23 + $0x170] sm:$0xff]  ;;  %v578_v38 = vpack.c.bf16 %v346_v31, %v338_v30  ;;  %v435_v30 = vld [vmem:[%s3611_s23 + $0x428] sm:$0xff]  ;;  %v4291_v31 = vlaneseq }
 0x116   : > { %v580_v39 = vpack.c.bf16 %v348_v33, %v340_v32  ;;  %v443_v32 = vld [vmem:[%s3611_s23 + $0x468] sm:$0xff]  ;;  %v437_v33 = vld [vmem:[%s3611_s23 + $0x438] sm:$0xff] }
 0x117   : > { %v627_v37 = vpack.c.bf16 %v443_v32, %v435_v30  ;;  %v491_v32 = vld [vmem:[%s3611_s23 + $0x5e8] sm:$0xff] }
 0x11b   : > { %1629 = vmatmul.mubr.bf16.gmra.mxu0 %v662_v42  ;;  %v354_v42 = vld [vmem:[%s3611_s23 + $0x1a0] sm:$0xff] }
 0x11c   : > { %1822 = vmatmul.mubr.bf16.gmra.mxu1 %v664_v43  ;;  %1638 = vmatprep.mubr.bf16.mxu0 %v671_v44  ;;  %v362_v43 = vld [vmem:[%s3611_s23 + $0x1e0] sm:$0xff]  ;;  %v356_v44 = vld [vmem:[%s3611_s23 + $0x1b0] sm:$0xff] }
 0x11d   : > { %1831 = vmatprep.mubr.bf16.mxu1 %v673_v45  ;;  %v364_v45 = vld [vmem:[%s3611_s23 + $0x1f0] sm:$0xff]  ;;  %v586_v50 = vpack.c.bf16 %v362_v43, %v354_v42  ;;  %v442_v42 = vld [vmem:[%s3611_s23 + $0x460] sm:$0xff] }
 0x11e   : > { %v588_v51 = vpack.c.bf16 %v364_v45, %v356_v44  ;;  %v436_v44 = vld [vmem:[%s3611_s23 + $0x430] sm:$0xff] }
 0x11f   : > { %v444_v45 = vld [vmem:[%s3611_s23 + $0x470] sm:$0xff] }
 0x123   : > { %1639 = vmatmul.mubr.bf16.gmra.mxu0 %v670_v54  ;;  %v370_v54 = vld [vmem:[%s3611_s23 + $0x220] sm:$0xff] }
 0x124   : > { %1832 = vmatmul.mubr.bf16.gmra.mxu1 %v672_v55  ;;  %1648 = vmatprep.mubr.bf16.mxu0 %v679_v56  ;;  %v378_v55 = vld [vmem:[%s3611_s23 + $0x260] sm:$0xff]  ;;  %v372_v56 = vld [vmem:[%s3611_s23 + $0x230] sm:$0xff] }
 0x125   : > { %1841 = vmatprep.mubr.bf16.mxu1 %v681_v57  ;;  %v380_v57 = vld [vmem:[%s3611_s23 + $0x270] sm:$0xff]  ;;  %v594_v62 = vpack.c.bf16 %v378_v55, %v370_v54  ;;  %v635_v54 = vpack.c.bf16 %v459_v47, %v451_v46  ;;  %v637_v55 = vpack.c.bf16 %v461_v49, %v453_v48 }
 0x126   : > { %v596_v63 = vpack.c.bf16 %v380_v57, %v372_v56 }
 0x12b   : > { %1649 = vmatmul.mubr.bf16.gmra.mxu0 %v678_v2  ;;  %v386_v2 = vld [vmem:[%s3611_s23 + $0x2a0] sm:$0xff] }
 0x12c   : > { %1842 = vmatmul.mubr.bf16.gmra.mxu1 %v680_v3  ;;  %1884 = vmatprep.mubr.bf16.mxu0 %v563_v4  ;;  %v394_v3 = vld [vmem:[%s3611_s23 + $0x2e0] sm:$0xff]  ;;  %v388_v4 = vld [vmem:[%s3611_s23 + $0x2b0] sm:$0xff] }
 0x12d   : > { %2077 = vmatprep.mubr.bf16.mxu1 %v565_v5  ;;  %v396_v5 = vld [vmem:[%s3611_s23 + $0x2f0] sm:$0xff]  ;;  %v602_v10 = vpack.c.bf16 %v394_v3, %v386_v2  ;;  %v475_v3 = vld [vmem:[%s3611_s23 + $0x568] sm:$0xff] }
 0x12e   : > { %v604_v11 = vpack.c.bf16 %v396_v5, %v388_v4  ;;  %v469_v4 = vld [vmem:[%s3611_s23 + $0x538] sm:$0xff] }
 0x12f   : > { %v477_v5 = vld [vmem:[%s3611_s23 + $0x578] sm:$0xff] }
 0x133   : > { %1885 = vmatmul.mubr.bf16.vlgmr.msra.gmra.mxu0 %v562_v14  ;;  %v402_v14 = vld [vmem:[%s3611_s23 + $0x320] sm:$0xff] }
 0x134   : > { %2078 = vmatmul.mubr.bf16.vlgmr.msra.gmra.mxu1 %v564_v15  ;;  %1894 = vmatprep.mubr.bf16.mxu0 %v571_v16  ;;  %v410_v15 = vld [vmem:[%s3611_s23 + $0x360] sm:$0xff]  ;;  %v404_v16 = vld [vmem:[%s3611_s23 + $0x330] sm:$0xff] }
 0x135   : > { %2087 = vmatprep.mubr.bf16.mxu1 %v573_v17  ;;  %v412_v17 = vld [vmem:[%s3611_s23 + $0x370] sm:$0xff]  ;;  %v610_v22 = vpack.c.bf16 %v410_v15, %v402_v14  ;;  %v645_v15 = vpack.c.bf16 %v477_v5, %v469_v4 }
 0x136   : > { %v612_v23 = vpack.c.bf16 %v412_v17, %v404_v16 }
 0x13b   : > { %1895 = vmatmul.mubr.bf16.gmra.mxu0 %v570_v26  ;;  %v418_v26 = vld [vmem:[%s3611_s23 + $0x3a0] sm:$0xff] }
 0x13c   : > { %2088 = vmatmul.mubr.bf16.gmra.mxu1 %v572_v27  ;;  %1904 = vmatprep.mubr.bf16.mxu0 %v579_v28  ;;  %v426_v27 = vld [vmem:[%s3611_s23 + $0x3e0] sm:$0xff]  ;;  %v420_v28 = vld [vmem:[%s3611_s23 + $0x3b0] sm:$0xff] }
 0x13d   : > { %2097 = vmatprep.mubr.bf16.mxu1 %v581_v29  ;;  %v428_v29 = vld [vmem:[%s3611_s23 + $0x3f0] sm:$0xff]  ;;  %v618_v35 = vpack.c.bf16 %v426_v27, %v418_v26 }
 0x13e   : > { %v620_v36 = vpack.c.bf16 %v428_v29, %v420_v28  ;;  %v468_v26 = vld [vmem:[%s3611_s23 + $0x530] sm:$0xff]  ;;  %v483_v28 = vld [vmem:[%s3611_s23 + $0x5a8] sm:$0xff] }
 0x13f   : > { %v476_v27 = vld [vmem:[%s3611_s23 + $0x570] sm:$0xff] }
 0x143   : > { %1905 = vmatmul.mubr.bf16.gmra.mxu0 %v578_v38  ;;  %v629_v38 = vpack.c.bf16 %v445_v34, %v437_v33  ;;  %v485_v33 = vld [vmem:[%s3611_s23 + $0x5b8] sm:$0xff] }
 0x144   : > { %2098 = vmatmul.mubr.bf16.gmra.mxu1 %v580_v39  ;;  %1914 = vmatprep.mubr.bf16.mxu0 %v587_v40  ;;  %v3822_v39 = vshrl.u32 %v4291_v31, 7  ;;  %v814_v40 = vld [vmem:[#allocation7] sm:$0x3]  ;;  %v493_v34 = vld [vmem:[%s3611_s23 + $0x5f8] sm:$0xff] }
 0x145   : > { %2107 = vmatprep.mubr.bf16.mxu1 %v589_v41  ;;  %v434_v41 = vld [vmem:[%s3611_s23 + $0x420] sm:$0xff] }
 0x146   : > { %4304 = vst [vmem:[#allocation15_spill] sm:$0xff] %v3822_v39  ;;  %v818_v43 = vsub.s32 0, %v3822_v39 }
 0x14b   : > { %1915 = vmatmul.mubr.bf16.gmra.mxu0 %v586_v50  ;;  %v822_v50 = vsub.s32 1, %v3822_v39 }
 0x14c   : > { %2108 = vmatmul.mubr.bf16.gmra.mxu1 %v588_v51  ;;  %1924 = vmatprep.mubr.bf16.mxu0 %v595_v52  ;;  %v626_v51 = vpack.c.bf16 %v442_v42, %v434_v41  ;;  %v628_v52 = vpack.c.bf16 %v444_v45, %v436_v44  ;;  %v644_v41 = vpack.c.bf16 %v476_v27, %v468_v26  ;;  %v500_v26 = vld [vmem:[%s3611_s23 + $0x630] sm:$0xff] }
 0x14d   : > { %2117 = vmatprep.mubr.bf16.mxu1 %v597_v53  ;;  %v3834_v53 = vrot.slane %v814_v40, %v818_v43  ;;  %v3836_v56 = vrot.slane %v814_v40, %v822_v50  ;;  %v651_v44 = vpack.c.bf16 %v491_v32, %v483_v28  ;;  %v653_v45 = vpack.c.bf16 %v493_v34, %v485_v33  ;;  %v508_v27 = vld [vmem:[%s3611_s23 + $0x670] sm:$0xff]  ;;  %v515_v28 = vld [vmem:[%s3611_s23 + $0x6a8] sm:$0xff]  ;;  %v517_v33 = vld [vmem:[%s3611_s23 + $0x6b8] sm:$0xff] }
 0x14e   : > { %v523_v32 = vld [vmem:[%s3611_s23 + $0x6e8] sm:$0xff]  ;;  %v525_v34 = vld [vmem:[%s3611_s23 + $0x6f8] sm:$0xff] }
 0x153   : > { %1925 = vmatmul.mubr.bf16.gmra.mxu0 %v594_v62  ;;  %v452_v62 = vld [vmem:[%s3611_s23 + $0x4b0] sm:$0xff] }
 0x154   : > { %2118 = vmatmul.mubr.bf16.gmra.mxu1 %v596_v63  ;;  %1934 = vmatprep.mubr.bf16.mxu0 %v603_v0  ;;  %v460_v63 = vld [vmem:[%s3611_s23 + $0x4f0] sm:$0xff]  ;;  %v467_v0 = vld [vmem:[%s3611_s23 + $0x528] sm:$0xff] }
 0x155   : > { %2127 = vmatprep.mubr.bf16.mxu1 %v605_v1  ;;  %v643_v14 = vpack.c.bf16 %v475_v3, %v467_v0  ;;  %v501_v0 = vld [vmem:[%s3611_s23 + $0x638] sm:$0xff] }
 0x15b   : > { %1935 = vmatmul.mubr.bf16.gmra.mxu0 %v602_v10  ;;  %v634_v10 = vpack.c.bf16 %v458_v60, %v450_v59  ;;  %v492_v59 = vld [vmem:[%s3611_s23 + $0x5f0] sm:$0xff]  ;;  %v499_v60 = vld [vmem:[%s3611_s23 + $0x628] sm:$0xff] }
 0x15c   : > { %2128 = vmatmul.mubr.bf16.gmra.mxu1 %v604_v11  ;;  %1944 = vmatprep.mubr.bf16.mxu0 %v611_v12  ;;  %v636_v11 = vpack.c.bf16 %v460_v63, %v452_v62  ;;  %v507_v63 = vld [vmem:[%s3611_s23 + $0x668] sm:$0xff] }
 0x15d   : > { %2137 = vmatprep.mubr.bf16.mxu1 %v613_v13 }
 0x163   : > { %1945 = vmatmul.mubr.bf16.gmra.mxu0 %v610_v22  ;;  %v466_v22 = vld [vmem:[%s3611_s23 + $0x520] sm:$0xff] }
 0x164   : > { %2138 = vmatmul.mubr.bf16.gmra.mxu1 %v612_v23  ;;  %1954 = vmatprep.mubr.bf16.mxu0 %v619_v24  ;;  %v474_v23 = vld [vmem:[%s3611_s23 + $0x560] sm:$0xff] }
 0x165   : > { %2147 = vmatprep.mubr.bf16.mxu1 %v621_v25  ;;  %v642_v40 = vpack.c.bf16 %v474_v23, %v466_v22  ;;  %v506_v22 = vld [vmem:[%s3611_s23 + $0x660] sm:$0xff] }
 0x16b   : > { %1955 = vmatmul.mubr.bf16.gmra.mxu0 %v618_v35 }
 0x16c   : > { %2148 = vmatmul.mubr.bf16.gmra.mxu1 %v620_v36  ;;  %1964 = vmatprep.mubr.bf16.mxu0 %v627_v37 }
 0x16d   : > { %2157 = vmatprep.mubr.bf16.mxu1 %v629_v38 }
 0x173   : > { %v1500_v57 = vpop.f32.mrf.mxu0  ;;  %1965 = vmatmul.mubr.bf16.gmra.mxu0 %v626_v51 }
 0x174   : > { %v1693_v58 = vpop.f32.mrf.mxu1  ;;  %2158 = vmatmul.mubr.bf16.gmra.mxu1 %v628_v52  ;;  %v1501_v61 = vadd.f32 %v1500_v57, %v3834_v53  ;;  %1974 = vmatprep.mubr.bf16.mxu0 %v635_v54  ;;  %v482_v52 = vld [vmem:[%s3611_s23 + $0x5a0] sm:$0xff] }
 0x175   : > { %2167 = vmatprep.mubr.bf16.mxu1 %v637_v55  ;;  %v1502_v1 = vpop.f32.mrf.mxu0  ;;  %v490_v54 = vld [vmem:[%s3611_s23 + $0x5e0] sm:$0xff] }
 0x176   : > { %v1695_v2 = vpop.f32.mrf.mxu1  ;;  %v3847_v6 = vadd.f32 %v1693_v58, %v1501_v61  ;;  %v1503_v7 = vadd.f32 %v1502_v1, %v3836_v56  ;;  %v484_v58 = vld [vmem:[%s3611_s23 + $0x5b0] sm:$0xff]  ;;  %v509_v1 = vld [vmem:[%s3611_s23 + $0x678] sm:$0xff] }
 0x177   : > { %v1504_v8 = vpop.f32.mrf.mxu0 }
 0x178   : > { %v1697_v9 = vpop.f32.mrf.mxu1  ;;  %v3850_v12 = vadd.f32 %v1695_v2, %v1503_v7  ;;  %v1505_v13 = vadd.f32 %v1504_v8, %v3834_v53  ;;  %v650_v7 = vpack.c.bf16 %v490_v54, %v482_v52  ;;  %v652_v8 = vpack.c.bf16 %v492_v59, %v484_v58  ;;  %v514_v58 = vld [vmem:[%s3611_s23 + $0x6a0] sm:$0xff] }
 0x179   : > { %v1506_v16 = vpop.f32.mrf.mxu0  ;;  %v522_v59 = vld [vmem:[%s3611_s23 + $0x6e0] sm:$0xff] }
 0x17a   : > { %v1699_v17 = vpop.f32.mrf.mxu1  ;;  %v3853_v18 = vadd.f32 %v1697_v9, %v1505_v13  ;;  %v1507_v19 = vadd.f32 %v1506_v16, %v3836_v56  ;;  %v661_v13 = vpack.c.bf16 %v509_v1, %v501_v0  ;;  %v531_v0 = vld [vmem:[%s3611_s23 + $0x728] sm:$0xff] }
 0x17b   : > { %v1510_v20 = vpop.f32.mrf.mxu0  ;;  %1975 = vmatmul.mubr.bf16.gmra.mxu0 %v634_v10 }
 0x17c   : > { %v1703_v21 = vpop.f32.mrf.mxu1  ;;  %2168 = vmatmul.mubr.bf16.gmra.mxu1 %v636_v11  ;;  %v3858_v24 = vadd.f32 %v1699_v17, %v1507_v19  ;;  %v1511_v25 = vadd.f32 %v1510_v20, %v3834_v53  ;;  %1984 = vmatprep.mubr.bf16.mxu0 %v643_v14  ;;  %v659_v11 = vpack.c.bf16 %v507_v63, %v499_v60  ;;  %v524_v63 = vld [vmem:[%s3611_s23 + $0x6f0] sm:$0xff] }
 0x17d   : > { %2177 = vmatprep.mubr.bf16.mxu1 %v645_v15  ;;  %v1512_v29 = vpop.f32.mrf.mxu0 }
 0x17e   : > { %v1705_v30 = vpop.f32.mrf.mxu1  ;;  %v3867_v35 = vadd.f32 %v1703_v21, %v1511_v25  ;;  %v1513_v36 = vadd.f32 %v1512_v29, %v3836_v56  ;;  %v498_v21 = vld [vmem:[%s3611_s23 + $0x620] sm:$0xff] }
 0x17f   : > { %v1514_v37 = vpop.f32.mrf.mxu0 }
 0x180   : > { %v1707_v38 = vpop.f32.mrf.mxu1  ;;  %v3870_v42 = vadd.f32 %v1705_v30, %v1513_v36  ;;  %v1515_v43 = vadd.f32 %v1514_v37, %v3834_v53 }
 0x181   : > { %v1516_v46 = vpop.f32.mrf.mxu0 }
 0x182   : > { %v1709_v47 = vpop.f32.mrf.mxu1  ;;  %v3873_v48 = vadd.f32 %v1707_v38, %v1515_v43  ;;  %v1517_v49 = vadd.f32 %v1516_v46, %v3836_v56  ;;  %v660_v43 = vpack.c.bf16 %v508_v27, %v500_v26  ;;  %v667_v46 = vpack.c.bf16 %v523_v32, %v515_v28  ;;  %v530_v28 = vld [vmem:[%s3611_s23 + $0x720] sm:$0xff] }
 0x183   : > { %v1520_v50 = vpop.f32.mrf.mxu0  ;;  %1985 = vmatmul.mubr.bf16.gmra.mxu0 %v642_v40 }
 0x184   : > { %v1713_v51 = vpop.f32.mrf.mxu1  ;;  %2178 = vmatmul.mubr.bf16.gmra.mxu1 %v644_v41  ;;  %v3878_v55 = vadd.f32 %v1709_v47, %v1517_v49  ;;  %v1521_v57 = vadd.f32 %v1520_v50, %v3834_v53  ;;  %1994 = vmatprep.mubr.bf16.mxu0 %v651_v44  ;;  %v658_v41 = vpack.c.bf16 %v506_v22, %v498_v21 }
 0x185   : > { %2187 = vmatprep.mubr.bf16.mxu1 %v653_v45  ;;  %v1522_v61 = vpop.f32.mrf.mxu0  ;;  %v669_v47 = vpack.c.bf16 %v525_v34, %v517_v33  ;;  %v532_v33 = vld [vmem:[%s3611_s23 + $0x730] sm:$0xff] }
 0x186   : > { %v1715_v62 = vpop.f32.mrf.mxu1  ;;  %v3887_v2 = vadd.f32 %v1713_v51, %v1521_v57  ;;  %v1523_v3 = vadd.f32 %v1522_v61, %v3836_v56  ;;  %v540_v34 = vld [vmem:[%s3611_s23 + $0x770] sm:$0xff] }
 0x187   : > { %v1524_v4 = vpop.f32.mrf.mxu0 }
 0x188   : > { %v1717_v5 = vpop.f32.mrf.mxu1  ;;  %v3890_v9 = vadd.f32 %v1715_v62, %v1523_v3  ;;  %v1525_v10 = vadd.f32 %v1524_v4, %v3834_v53  ;;  %v516_v62 = vld [vmem:[%s3611_s23 + $0x6b0] sm:$0xff]  ;;  %v539_v4 = vld [vmem:[%s3611_s23 + $0x768] sm:$0xff] }
 0x189   : > { %v1526_v14 = vpop.f32.mrf.mxu0 }
 0x18a   : > { %v1719_v15 = vpop.f32.mrf.mxu1  ;;  %v3893_v16 = vadd.f32 %v1717_v5, %v1525_v10  ;;  %v1527_v17 = vadd.f32 %v1526_v14, %v3836_v56  ;;  %v533_v5 = vld [vmem:[%s3611_s23 + $0x738] sm:$0xff]  ;;  %v668_v14 = vpack.c.bf16 %v524_v63, %v516_v62 }
 0x18b   : > { %v1530_v19 = vpop.f32.mrf.mxu0  ;;  %1995 = vmatmul.mubr.bf16.gmra.mxu0 %v650_v7  ;;  %v541_v7 = vld [vmem:[%s3611_s23 + $0x778] sm:$0xff] }
 0x18c   : > { %v1723_v20 = vpop.f32.mrf.mxu1  ;;  %2188 = vmatmul.mubr.bf16.gmra.mxu1 %v652_v8  ;;  %v3898_v23 = vadd.f32 %v1719_v15, %v1527_v17  ;;  %v1531_v25 = vadd.f32 %v1530_v19, %v3834_v53  ;;  %2004 = vmatprep.mubr.bf16.mxu0 %v659_v11  ;;  %v675_v17 = vpack.c.bf16 %v539_v4, %v531_v0 }
 0x18d   : > { %2197 = vmatprep.mubr.bf16.mxu1 %v661_v13  ;;  %v1532_v29 = vpop.f32.mrf.mxu0  ;;  %v666_v13 = vpack.c.bf16 %v522_v59, %v514_v58  ;;  %v677_v19 = vpack.c.bf16 %v541_v7, %v533_v5 }
 0x18e   : > { %v1725_v30 = vpop.f32.mrf.mxu1  ;;  %v3907_v36 = vadd.f32 %v1723_v20, %v1531_v25  ;;  %v1533_v37 = vadd.f32 %v1532_v29, %v3836_v56  ;;  %v538_v29 = vld [vmem:[%s3611_s23 + $0x760] sm:$0xff] }
 0x18f   : > { %v1534_v38 = vpop.f32.mrf.mxu0 }
 0x190   : > { %v1727_v40 = vpop.f32.mrf.mxu1  ;;  %v3910_v44 = vadd.f32 %v1725_v30, %v1533_v37  ;;  %v1535_v45 = vadd.f32 %v1534_v38, %v3834_v53  ;;  %v547_v37 = vld [vmem:[%s3611_s23 + $0x7a8] sm:$0xff] }
 0x191   : > { %v1536_v49 = vpop.f32.mrf.mxu0 }
 0x192   : > { %v1729_v50 = vpop.f32.mrf.mxu1  ;;  %v3913_v51 = vadd.f32 %v1727_v40, %v1535_v45  ;;  %v1537_v52 = vadd.f32 %v1536_v49, %v3836_v56  ;;  %v557_v45 = vld [vmem:[%s3611_s23 + $0x7f8] sm:$0xff] }
 0x193   : > { %v1540_v54 = vpop.f32.mrf.mxu0  ;;  %2005 = vmatmul.mubr.bf16.gmra.mxu0 %v658_v41  ;;  %v555_v41 = vld [vmem:[%s3611_s23 + $0x7e8] sm:$0xff] }
 0x194   : > { %v1733_v57 = vpop.f32.mrf.mxu1  ;;  %2198 = vmatmul.mubr.bf16.gmra.mxu1 %v660_v43  ;;  %v3918_v60 = vadd.f32 %v1729_v50, %v1537_v52  ;;  %v1541_v61 = vadd.f32 %v1540_v54, %v3834_v53  ;;  %2014 = vmatprep.mubr.bf16.mxu0 %v667_v46  ;;  %v549_v43 = vld [vmem:[%s3611_s23 + $0x7b8] sm:$0xff]  ;;  %v674_v52 = vpack.c.bf16 %v538_v29, %v530_v28 }
 0x195   : > { %2207 = vmatprep.mubr.bf16.mxu1 %v669_v47  ;;  %v3924_v1 = vpop.f32.mrf.mxu0  ;;  %v676_v54 = vpack.c.bf16 %v540_v34, %v532_v33  ;;  %v683_v59 = vpack.c.bf16 %v555_v41, %v547_v37 }
 0x196   : > { %v3926_v3 = vpop.f32.mrf.mxu1  ;;  %v3931_v8 = vadd.f32 %v1733_v57, %v1541_v61  ;;  %v685_v61 = vpack.c.bf16 %v557_v45, %v549_v43 }
 0x197   : > { %v1544_v10 = vpop.f32.mrf.mxu0 }
 0x198   : > { %v1737_v11 = vpop.f32.mrf.mxu1  ;;  %v1545_v15 = vadd.f32 %v1544_v10, %v3834_v53  ;;  %v546_v10 = vld [vmem:[%s3611_s23 + $0x7a0] sm:$0xff] }
 0x199   : > { %v1546_v20 = vpop.f32.mrf.mxu0 }
 0x19a   : > { %v1739_v21 = vpop.f32.mrf.mxu1  ;;  %v3934_v22 = vadd.f32 %v1737_v11, %v1545_v15  ;;  %v1547_v25 = vadd.f32 %v1546_v20, %v3836_v56  ;;  %v548_v15 = vld [vmem:[%s3611_s23 + $0x7b0] sm:$0xff] }
 0x19b   : > { %v1550_v26 = vpop.f32.mrf.mxu0  ;;  %2015 = vmatmul.mubr.bf16.gmra.mxu0 %v666_v13 }
 0x19c   : > { %v1743_v27 = vpop.f32.mrf.mxu1  ;;  %2208 = vmatmul.mubr.bf16.gmra.mxu1 %v668_v14  ;;  %v3939_v30 = vadd.f32 %v1739_v21, %v1547_v25  ;;  %v1551_v32 = vadd.f32 %v1550_v26, %v3834_v53  ;;  %2024 = vmatprep.mubr.bf16.mxu0 %v675_v17  ;;  %v554_v14 = vld [vmem:[%s3611_s23 + $0x7e0] sm:$0xff]  ;;  %v556_v17 = vld [vmem:[%s3611_s23 + $0x7f0] sm:$0xff] }
 0x19d   : > { %2217 = vmatprep.mubr.bf16.mxu1 %v677_v19  ;;  %v1552_v38 = vpop.f32.mrf.mxu0  ;;  %v682_v28 = vpack.c.bf16 %v554_v14, %v546_v10  ;;  %v684_v29 = vpack.c.bf16 %v556_v17, %v548_v15 }
 0x19e   : > { %v1745_v40 = vpop.f32.mrf.mxu1  ;;  %v3948_v46 = vadd.f32 %v1743_v27, %v1551_v32  ;;  %v1553_v47 = vadd.f32 %v1552_v38, %v3836_v56 }
 0x19f   : > { %v1554_v49 = vpop.f32.mrf.mxu0 }
 0x1a0   : > { %v1747_v50 = vpop.f32.mrf.mxu1  ;;  %v3951_v57 = vadd.f32 %v1745_v40, %v1553_v47  ;;  %v1555_v58 = vadd.f32 %v1554_v49, %v3834_v53 }
 0x1a1   : > { %v1556_v62 = vpop.f32.mrf.mxu0 }
 0x1a2   : > { %v1749_v63 = vpop.f32.mrf.mxu1  ;;  %v3954_v0 = vadd.f32 %v1747_v50, %v1555_v58  ;;  %v1557_v4 = vadd.f32 %v1556_v62, %v3836_v56 }
 0x1a3   : > { %v1560_v5 = vpop.f32.mrf.mxu0  ;;  %2025 = vmatmul.mubr.bf16.gmra.mxu0 %v674_v52 }
 0x1a4   : > { %v1753_v7 = vpop.f32.mrf.mxu1  ;;  %2218 = vmatmul.mubr.bf16.gmra.mxu1 %v676_v54  ;;  %v3958_v11 = vadd.f32 %v1749_v63, %v1557_v4  ;;  %v1561_v13 = vadd.f32 %v1560_v5, %v3834_v53  ;;  %2034 = vmatprep.mubr.bf16.mxu0 %v683_v59 }
 0x1a5   : > { %2227 = vmatprep.mubr.bf16.mxu1 %v685_v61  ;;  %v1562_v19 = vpop.f32.mrf.mxu0 }
 0x1a6   : > { %v1755_v20 = vpop.f32.mrf.mxu1  ;;  %v3964_v21 = vadd.f32 %v1753_v7, %v1561_v13  ;;  %v1563_v25 = vadd.f32 %v1562_v19, %v3836_v56 }
 0x1a7   : > { %v1564_v26 = vpop.f32.mrf.mxu0 }
 0x1a8   : > { %v1757_v27 = vpop.f32.mrf.mxu1  ;;  %v3967_v32 = vadd.f32 %v1755_v20, %v1563_v25  ;;  %v1565_v33 = vadd.f32 %v1564_v26, %v3834_v53 }
 0x1a9   : > { %v1566_v34 = vpop.f32.mrf.mxu0 }
 0x1aa   : > { %v1759_v37 = vpop.f32.mrf.mxu1  ;;  %v3970_v38 = vadd.f32 %v1757_v27, %v1565_v33  ;;  %v1567_v40 = vadd.f32 %v1566_v34, %v3836_v56 }
 0x1ab   : > { %v1570_v41 = vpop.f32.mrf.mxu0  ;;  %2035 = vmatmul.mubr.bf16.gmra.mxu0 %v682_v28 }
 0x1ac   : > { %v1763_v43 = vpop.f32.mrf.mxu1  ;;  %2228 = vmatmul.mubr.bf16.gmra.mxu1 %v684_v29  ;;  %v3973_v45 = vadd.f32 %v1759_v37, %v1567_v40  ;;  %v1571_v47 = vadd.f32 %v1570_v41, %v3834_v53 }
 0x1ad   : > { %v1572_v49 = vpop.f32.mrf.mxu0 }
 0x1ae   : > { %v1765_v50 = vpop.f32.mrf.mxu1  ;;  %v3976_v52 = vadd.f32 %v1763_v43, %v1571_v47  ;;  %v1573_v54 = vadd.f32 %v1572_v49, %v3836_v56 }
 0x1af   : > { %v1574_v58 = vpop.f32.mrf.mxu0 }
 0x1b0   : > { %v1767_v59 = vpop.f32.mrf.mxu1  ;;  %v3979_v61 = vadd.f32 %v1765_v50, %v1573_v54  ;;  %v1575_v62 = vadd.f32 %v1574_v58, %v3834_v53 }
 0x1b1   : > { %v1576_v63 = vpop.f32.mrf.mxu0 }
 0x1b2   : > { %v1769_v4 = vpop.f32.mrf.mxu1  ;;  %v3982_v5 = vadd.f32 %v1767_v59, %v1575_v62  ;;  %v1577_v7 = vadd.f32 %v1576_v63, %v3836_v56 }
 0x1b3   : > { %v1580_v10 = vpop.f32.mrf.mxu0 }
 0x1b4   : > { %v1773_v13 = vpop.f32.mrf.mxu1  ;;  %v3985_v14 = vadd.f32 %v1769_v4, %v1577_v7  ;;  %v1581_v15 = vadd.f32 %v1580_v10, %v3834_v53 }
 0x1b5   : > { %v1582_v17 = vpop.f32.mrf.mxu0 }
 0x1b6   : > { %v1775_v19 = vpop.f32.mrf.mxu1  ;;  %v3988_v20 = vadd.f32 %v1773_v13, %v1581_v15  ;;  %v1583_v25 = vadd.f32 %v1582_v17, %v3836_v56 }
 0x1b7   : > { %v1584_v26 = vpop.f32.mrf.mxu0 }
 0x1b8   : > { %v1777_v27 = vpop.f32.mrf.mxu1  ;;  %v3991_v28 = vadd.f32 %v1775_v19, %v1583_v25  ;;  %v1585_v29 = vadd.f32 %v1584_v26, %v3834_v53 }
 0x1b9   : > { %v1586_v33 = vpop.f32.mrf.mxu0 }
 0x1ba   : > { %v1779_v34 = vpop.f32.mrf.mxu1  ;;  %v3994_v37 = vadd.f32 %v1777_v27, %v1585_v29  ;;  %v1587_v40 = vadd.f32 %v1586_v33, %v3836_v56 }
 0x1bb   : > { %v1590_v41 = vpop.f32.mrf.mxu0 }
 0x1bc   : > { %v1783_v43 = vpop.f32.mrf.mxu1  ;;  %v3997_v47 = vadd.f32 %v1779_v34, %v1587_v40  ;;  %v1591_v49 = vadd.f32 %v1590_v41, %v3834_v53 }
 0x1bd   : > { %v1592_v50 = vpop.f32.mrf.mxu0 }
 0x1be   : > { %v1785_v54 = vpop.f32.mrf.mxu1  ;;  %v4000_v58 = vadd.f32 %v1783_v43, %v1591_v49  ;;  %v1593_v59 = vadd.f32 %v1592_v50, %v3836_v56 }
 0x1bf   : > { %v1594_v62 = vpop.f32.mrf.mxu0 }
 0x1c0   : > { %v1787_v63 = vpop.f32.mrf.mxu1  ;;  %v4003_v4 = vadd.f32 %v1785_v54, %v1593_v59  ;;  %v1595_v7 = vadd.f32 %v1594_v62, %v3834_v53 }
 0x1c1   : > { %v1596_v10 = vpop.f32.mrf.mxu0 }
 0x1c2   : > { %v1789_v13 = vpop.f32.mrf.mxu1  ;;  %v4006_v15 = vadd.f32 %v1787_v63, %v1595_v7  ;;  %v1597_v17 = vadd.f32 %v1596_v10, %v3836_v56 }
 0x1c3   : > { %v1600_v19 = vpop.f32.mrf.mxu0 }
 0x1c4   : > { %v1793_v25 = vpop.f32.mrf.mxu1  ;;  %v4009_v26 = vadd.f32 %v1789_v13, %v1597_v17  ;;  %v1601_v27 = vadd.f32 %v1600_v19, %v3834_v53 }
 0x1c5   : > { %v1602_v29 = vpop.f32.mrf.mxu0 }
 0x1c6   : > { %v1795_v33 = vpop.f32.mrf.mxu1  ;;  %v4012_v34 = vadd.f32 %v1793_v25, %v1601_v27  ;;  %v1603_v40 = vadd.f32 %v1602_v29, %v3836_v56 }
 0x1c7   : > { %v1604_v41 = vpop.f32.mrf.mxu0 }
 0x1c8   : > { %v1797_v43 = vpop.f32.mrf.mxu1  ;;  %v4015_v49 = vadd.f32 %v1795_v33, %v1603_v40  ;;  %v1605_v50 = vadd.f32 %v1604_v41, %v3834_v53 }
 0x1c9   : > { %v1606_v54 = vpop.f32.mrf.mxu0 }
 0x1ca   : > { %v1799_v59 = vpop.f32.mrf.mxu1  ;;  %v4018_v62 = vadd.f32 %v1797_v43, %v1605_v50  ;;  %v1607_v63 = vadd.f32 %v1606_v54, %v3836_v56 }
 0x1cb   : > { %v1610_v7 = vpop.f32.mrf.mxu0 }
 0x1cc   : > { %v1803_v10 = vpop.f32.mrf.mxu1  ;;  %v4021_v13 = vadd.f32 %v1799_v59, %v1607_v63  ;;  %v1611_v17 = vadd.f32 %v1610_v7, %v3834_v53 }
 0x1cd   : > { %v1612_v19 = vpop.f32.mrf.mxu0 }
 0x1ce   : > { %4305 = vst [vmem:[#allocation16_spill] sm:$0xff] %v4021_v13  ;;  %v1805_v25 = vpop.f32.mrf.mxu1  ;;  %v4024_v27 = vadd.f32 %v1803_v10, %v1611_v17  ;;  %v1613_v29 = vadd.f32 %v1612_v19, %v3836_v56 }
 0x1cf   : > { %v1614_v33 = vpop.f32.mrf.mxu0 }
 0x1d0   : > { %4306 = vst [vmem:[#allocation17_spill] sm:$0xff] %v4024_v27  ;;  %v1807_v40 = vpop.f32.mrf.mxu1  ;;  %v4027_v41 = vadd.f32 %v1805_v25, %v1613_v29  ;;  %v1615_v43 = vadd.f32 %v1614_v33, %v3834_v53 }
 0x1d1   : > { %v1616_v50 = vpop.f32.mrf.mxu0 }
 0x1d2   : > { %4307 = vst [vmem:[#allocation18_spill] sm:$0xff] %v4027_v41  ;;  %v1809_v54 = vpop.f32.mrf.mxu1  ;;  %v4030_v31 = vadd.f32 %v1807_v40, %v1615_v43  ;;  %v1617_v59 = vadd.f32 %v1616_v50, %v3836_v56 }
 0x1d3   : > { %v1620_v63 = vpop.f32.mrf.mxu0 }
 0x1d4   : > { %4308 = vst [vmem:[#allocation19_spill] sm:$0xff] %v4030_v31  ;;  %v1813_v7 = vpop.f32.mrf.mxu1  ;;  %v4033_v39 = vadd.f32 %v1809_v54, %v1617_v59  ;;  %v1621_v10 = vadd.f32 %v1620_v63, %v3834_v53 }
 0x1d5   : > { %v1622_v17 = vpop.f32.mrf.mxu0 }
 0x1d6   : > { %4309 = vst [vmem:[#allocation20_spill] sm:$0xff] %v4033_v39  ;;  %v1815_v19 = vpop.f32.mrf.mxu1  ;;  %v4036_v27 = vadd.f32 %v1813_v7, %v1621_v10  ;;  %v1623_v25 = vadd.f32 %v1622_v17, %v3836_v56 }
 0x1d7   : > { %v1624_v29 = vpop.f32.mrf.mxu0 }
 0x1d8   : > { %4310 = vst [vmem:[#allocation21_spill] sm:$0xff] %v4036_v27  ;;  %v1817_v33 = vpop.f32.mrf.mxu1  ;;  %v4039_v41 = vadd.f32 %v1815_v19, %v1623_v25  ;;  %v1625_v40 = vadd.f32 %v1624_v29, %v3834_v53 }
 0x1d9   : > { %v1626_v43 = vpop.f32.mrf.mxu0 }
 0x1da   : > { %4311 = vst [vmem:[#allocation22_spill] sm:$0xff] %v4039_v41  ;;  %v1819_v50 = vpop.f32.mrf.mxu1  ;;  %v4042_v31 = vadd.f32 %v1817_v33, %v1625_v40  ;;  %v1627_v54 = vadd.f32 %v1626_v43, %v3836_v56 }
 0x1db   : > { %v1630_v59 = vpop.f32.mrf.mxu0 }
 0x1dc   : > { %4312 = vst [vmem:[#allocation23_spill] sm:$0xff] %v4042_v31  ;;  %v1823_v63 = vpop.f32.mrf.mxu1  ;;  %v4045_v39 = vadd.f32 %v1819_v50, %v1627_v54  ;;  %v1631_v7 = vadd.f32 %v1630_v59, %v3834_v53 }
 0x1dd   : > { %v1632_v10 = vpop.f32.mrf.mxu0 }
 0x1de   : > { %4313 = vst [vmem:[#allocation24_spill] sm:$0xff] %v4045_v39  ;;  %v1825_v17 = vpop.f32.mrf.mxu1  ;;  %v4048_v27 = vadd.f32 %v1823_v63, %v1631_v7  ;;  %v1633_v19 = vadd.f32 %v1632_v10, %v3836_v56 }
 0x1df   : > { %v1634_v25 = vpop.f32.mrf.mxu0 }
 0x1e0   : > { %4314 = vst [vmem:[#allocation25_spill] sm:$0xff] %v4048_v27  ;;  %v1827_v29 = vpop.f32.mrf.mxu1  ;;  %v4051_v41 = vadd.f32 %v1825_v17, %v1633_v19  ;;  %v1635_v33 = vadd.f32 %v1634_v25, %v3834_v53 }
 0x1e1   : > { %v1636_v40 = vpop.f32.mrf.mxu0 }
 0x1e2   : > { %4315 = vst [vmem:[#allocation26_spill] sm:$0xff] %v4051_v41  ;;  %v1829_v43 = vpop.f32.mrf.mxu1  ;;  %v4054_v31 = vadd.f32 %v1827_v29, %v1635_v33  ;;  %v1637_v50 = vadd.f32 %v1636_v40, %v3836_v56 }
 0x1e3   : > { %v1640_v54 = vpop.f32.mrf.mxu0 }
 0x1e4   : > { %4316 = vst [vmem:[#allocation27_spill] sm:$0xff] %v4054_v31  ;;  %v1833_v59 = vpop.f32.mrf.mxu1  ;;  %v4057_v39 = vadd.f32 %v1829_v43, %v1637_v50  ;;  %v1641_v63 = vadd.f32 %v1640_v54, %v3834_v53 }
 0x1e5   : > { %v1642_v7 = vpop.f32.mrf.mxu0 }
 0x1e6   : > { %4317 = vst [vmem:[#allocation28_spill] sm:$0xff] %v4057_v39  ;;  %v1835_v10 = vpop.f32.mrf.mxu1  ;;  %v4060_v27 = vadd.f32 %v1833_v59, %v1641_v63  ;;  %v1643_v17 = vadd.f32 %v1642_v7, %v3836_v56 }
 0x1e7   : > { %v1644_v19 = vpop.f32.mrf.mxu0 }
 0x1e8   : > { %4318 = vst [vmem:[#allocation29_spill] sm:$0xff] %v4060_v27  ;;  %v1837_v25 = vpop.f32.mrf.mxu1  ;;  %v4063_v41 = vadd.f32 %v1835_v10, %v1643_v17  ;;  %v1645_v29 = vadd.f32 %v1644_v19, %v3834_v53 }
 0x1e9   : > { %v1646_v33 = vpop.f32.mrf.mxu0 }
 0x1ea   : > { %4319 = vst [vmem:[#allocation30_spill] sm:$0xff] %v4063_v41  ;;  %v1839_v40 = vpop.f32.mrf.mxu1  ;;  %v4066_v31 = vadd.f32 %v1837_v25, %v1645_v29  ;;  %v1647_v43 = vadd.f32 %v1646_v33, %v3836_v56 }
 0x1eb   : > { %v1650_v50 = vpop.f32.mrf.mxu0 }
 0x1ec   : > { %4320 = vst [vmem:[#allocation31_spill] sm:$0xff] %v4066_v31  ;;  %v1843_v54 = vpop.f32.mrf.mxu1  ;;  %v4069_v39 = vadd.f32 %v1839_v40, %v1647_v43  ;;  %v1651_v59 = vadd.f32 %v1650_v50, %v3834_v53 }
 0x1ed   : > { %v1652_v63 = vpop.f32.mrf.mxu0 }
 0x1ee   : > { %4321 = vst [vmem:[#allocation32_spill] sm:$0xff] %v4069_v39  ;;  %v1845_v7 = vpop.f32.mrf.mxu1  ;;  %v4072_v27 = vadd.f32 %v1843_v54, %v1651_v59  ;;  %v1653_v10 = vadd.f32 %v1652_v63, %v3836_v56 }
 0x1ef   : > { %v1654_v17 = vpop.f32.mrf.mxu0 }
 0x1f0   : > { %4322 = vst [vmem:[#allocation33_spill] sm:$0xff] %v4072_v27  ;;  %v1847_v19 = vpop.f32.mrf.mxu1  ;;  %v4075_v41 = vadd.f32 %v1845_v7, %v1653_v10  ;;  %v1655_v25 = vadd.f32 %v1654_v17, %v3834_v53 }
 0x1f1   : > { %v1656_v29 = vpop.f32.mrf.mxu0 }
 0x1f2   : > { %4323 = vst [vmem:[#allocation34_spill] sm:$0xff] %v4075_v41  ;;  %v1849_v33 = vpop.f32.mrf.mxu1  ;;  %v4078_v31 = vadd.f32 %v1847_v19, %v1655_v25  ;;  %v1657_v40 = vadd.f32 %v1656_v29, %v3836_v56 }
 0x1f3   : > { %v1886_v43 = vpop.f32.mrf.mxu0 }
 0x1f4   : > { %4324 = vst [vmem:[#allocation35_spill] sm:$0xff] %v4078_v31  ;;  %v2079_v50 = vpop.f32.mrf.mxu1  ;;  %v4081_v39 = vadd.f32 %v1849_v33, %v1657_v40  ;;  %v1887_v54 = vadd.f32 %v1886_v43, %v3847_v6 }
 0x1f5   : > { %v1888_v59 = vpop.f32.mrf.mxu0 }
 0x1f6   : > { %v2081_v63 = vpop.f32.mrf.mxu1  ;;  %v2080_v27 = vadd.f32 %v2079_v50, %v1887_v54  ;;  %v1889_v7 = vadd.f32 %v1888_v59, %v3850_v12 }
 0x1f7   : > { %v1890_v10 = vpop.f32.mrf.mxu0 }
 0x1f8   : > { %v2083_v41 = vpop.f32.mrf.mxu1  ;;  %v2082_v53 = vadd.f32 %v2081_v63, %v1889_v7  ;;  %v1891_v17 = vadd.f32 %v1890_v10, %v3853_v18 }
 0x1f9   : > { %v1892_v19 = vpop.f32.mrf.mxu0 }
 0x1fa   : > { %v2085_v25 = vpop.f32.mrf.mxu1  ;;  %v2270_v31 = vmul.f32 0.5, %v2082_v53  ;;  %v2084_v29 = vadd.f32 %v2083_v41, %v1891_v17  ;;  %v1893_v13 = vadd.f32 %v1892_v19, %v3858_v24 }
 0x1fb   : > { %v1896_v33 = vpop.f32.mrf.mxu0 }
 0x1fc   : > { %v2089_v40 = vpop.f32.mrf.mxu1  ;;  %3113 = vtanh.f32 %v2270_v31  ;;  %v2086_v6 = vadd.f32 %v2085_v25, %v1893_v13  ;;  %v1897_v43 = vadd.f32 %v1896_v33, %v3867_v35 }
 0x1fd   : > { %v1898_v50 = vpop.f32.mrf.mxu0 }
 0x1fe   : > { %v2091_v54 = vpop.f32.mrf.mxu1  ;;  %v2271_v12 = vmul.f32 0.5, %v2086_v6  ;;  %v2090_v59 = vadd.f32 %v2089_v40, %v1897_v43  ;;  %v1899_v63 = vadd.f32 %v1898_v50, %v3870_v42 }
 0x1ff   : > { %v1900_v7 = vpop.f32.mrf.mxu0 }
 0x200   : > { %v2093_v18 = vpop.f32.mrf.mxu1  ;;  %3115 = vtanh.f32 %v2271_v12  ;;  %v2092_v10 = vadd.f32 %v2091_v54, %v1899_v63  ;;  %v1901_v41 = vadd.f32 %v1900_v7, %v3873_v48 }
 0x201   : > { %3117 = vtanh.f32 %v2080_v27  ;;  %v1902_v24 = vpop.f32.mrf.mxu0 }
 0x202   : > { %v2095_v53 = vpop.f32.mrf.mxu1  ;;  %v2272_v17 = vmul.f32 0.5, %v2092_v10  ;;  %v2094_v31 = vadd.f32 %v2093_v18, %v1901_v41  ;;  %v1903_v13 = vadd.f32 %v1902_v24, %v3878_v55 }
 0x203   : > { %v1906_v35 = vpop.f32.mrf.mxu0 }
 0x204   : > { %v2099_v19 = vpop.f32.mrf.mxu1  ;;  %3119 = vtanh.f32 %v2272_v17  ;;  %v2096_v25 = vadd.f32 %v2095_v53, %v1903_v13  ;;  %v1907_v33 = vadd.f32 %v1906_v35, %v3887_v2 }
 0x205   : > { %3121 = vtanh.f32 %v2084_v29  ;;  %v1908_v42 = vpop.f32.mrf.mxu0 }
 0x206   : > { %v2101_v40 = vpop.f32.mrf.mxu1  ;;  %v2273_v6 = vmul.f32 0.5, %v2096_v25  ;;  %v2100_v43 = vadd.f32 %v2099_v19, %v1907_v33  ;;  %v1909_v48 = vadd.f32 %v1908_v42, %v3890_v9 }
 0x207   : > { %v1910_v27 = vpop.f32.mrf.mxu0 }
 0x208   : > { %v2103_v50 = vpop.f32.mrf.mxu1  ;;  %3123 = vtanh.f32 %v2273_v6  ;;  %v2102_v54 = vadd.f32 %v2101_v40, %v1909_v48  ;;  %v1911_v12 = vadd.f32 %v1910_v27, %v3893_v16 }
 0x209   : > { %v3114_v55 = vpop.eup %3113  ;;  %3125 = vtanh.f32 %v2090_v59  ;;  %v1912_v63 = vpop.f32.mrf.mxu0 }
 0x20a   : > { %v2105_v7 = vpop.f32.mrf.mxu1  ;;  %v2334_v18 = vadd.f32 1.0, %v3114_v55  ;;  %v2274_v10 = vmul.f32 0.5, %v2102_v54  ;;  %v2104_v2 = vadd.f32 %v2103_v50, %v1911_v12  ;;  %v1913_v29 = vadd.f32 %v1912_v63, %v3898_v23 }
 0x20b   : > { %v1916_v41 = vpop.f32.mrf.mxu0  ;;  %v1543_v23 = vadd.f32 %v3924_v1, %v3836_v56 }
 0x20c   : > { %v2109_v24 = vpop.f32.mrf.mxu1  ;;  %v2366_v53 = vmul.f32 0.5, %v2334_v18  ;;  %3127 = vtanh.f32 %v2274_v10  ;;  %v2106_v9 = vadd.f32 %v2105_v7, %v1913_v29  ;;  %v1917_v17 = vadd.f32 %v1916_v41, %v3907_v36 }
 0x20d   : > { %v3116_v13 = vpop.eup %3115  ;;  %3129 = vtanh.f32 %v2094_v31  ;;  %v1918_v35 = vpop.f32.mrf.mxu0  ;;  %v1736_v56 = vadd.f32 %v3926_v3, %v1543_v23 }
 0x20e   : > { %v2111_v16 = vpop.f32.mrf.mxu1  ;;  %v3118_v19 = vpop.eup %3117  ;;  %v2335_v59 = vadd.f32 1.0, %v3116_v13  ;;  %v2275_v25 = vmul.f32 0.5, %v2106_v9  ;;  %v2110_v33 = vadd.f32 %v2109_v24, %v1917_v17  ;;  %v1919_v42 = vadd.f32 %v1918_v35, %v3910_v44 }
 0x20f   : > { %v1920_v40 = vpop.f32.mrf.mxu0  ;;  %v4099_v48 = vmul.f32 %v3118_v19, %v2366_v53 }
 0x210   : > { %v2113_v6 = vpop.f32.mrf.mxu1  ;;  %v2367_v27 = vmul.f32 0.5, %v2335_v59  ;;  %3131 = vtanh.f32 %v2275_v25  ;;  %v2112_v36 = vadd.f32 %v2111_v16, %v1919_v42  ;;  %v1921_v31 = vadd.f32 %v1920_v40, %v3913_v51 }
 0x211   : > { %v3120_v50 = vpop.eup %3119  ;;  %3133 = vtanh.f32 %v2100_v43  ;;  %v1922_v54 = vpop.f32.mrf.mxu0 }
 0x212   : > { %v2115_v12 = vpop.f32.mrf.mxu1  ;;  %v3122_v55 = vpop.eup %3121  ;;  %v2336_v63 = vadd.f32 1.0, %v3120_v50  ;;  %v2276_v7 = vmul.f32 0.5, %v2112_v36  ;;  %v2114_v44 = vadd.f32 %v2113_v6, %v1921_v31  ;;  %v1923_v18 = vadd.f32 %v1922_v54, %v3918_v60 }
 0x213   : > { %v1926_v1 = vpop.f32.mrf.mxu0  ;;  %v4104_v29 = vmul.f32 %v3122_v55, %v2367_v27 }
 0x214   : > { %v2119_v10 = vpop.f32.mrf.mxu1  ;;  %v2368_v41 = vmul.f32 0.5, %v2336_v63  ;;  %3135 = vtanh.f32 %v2276_v7  ;;  %v2116_v24 = vadd.f32 %v2115_v12, %v1923_v18  ;;  %v1927_v51 = vadd.f32 %v1926_v1, %v3931_v8 }
 0x215   : > { %v3124_v43 = vpop.eup %3123  ;;  %3137 = vtanh.f32 %v2104_v2  ;;  %v1928_v53 = vpop.f32.mrf.mxu0 }
 0x216   : > { %v2121_v9 = vpop.f32.mrf.mxu1  ;;  %v3126_v17 = vpop.eup %3125  ;;  %v2337_v13 = vadd.f32 1.0, %v3124_v43  ;;  %v2277_v35 = vmul.f32 0.5, %v2116_v24  ;;  %v2120_v16 = vadd.f32 %v2119_v10, %v1927_v51  ;;  %v1929_v60 = vadd.f32 %v1928_v53, %v1736_v56 }
 0x217   : > { %v1930_v19 = vpop.f32.mrf.mxu0  ;;  %v4107_v59 = vmul.f32 %v3126_v17, %v2368_v41 }
 0x218   : > { %v2123_v3 = vpop.f32.mrf.mxu1  ;;  %v2369_v25 = vmul.f32 0.5, %v2337_v13  ;;  %3139 = vtanh.f32 %v2277_v35  ;;  %v2122_v42 = vadd.f32 %v2121_v9, %v1929_v60  ;;  %v1931_v23 = vadd.f32 %v1930_v19, %v3934_v22 }
 0x219   : > { %v3128_v40 = vpop.eup %3127  ;;  %3141 = vtanh.f32 %v2110_v33  ;;  %v1932_v8 = vpop.f32.mrf.mxu0 }
 0x21a   : > { %v2125_v2 = vpop.f32.mrf.mxu1  ;;  %v3130_v6 = vpop.eup %3129  ;;  %v2338_v27 = vadd.f32 1.0, %v3128_v40  ;;  %v2278_v36 = vmul.f32 0.5, %v2122_v42  ;;  %v2124_v31 = vadd.f32 %v2123_v3, %v1931_v23  ;;  %v1933_v50 = vadd.f32 %v1932_v8, %v3939_v30 }
 0x21b   : > { %v1936_v54 = vpop.f32.mrf.mxu0  ;;  %v4111_v55 = vmul.f32 %v3130_v6, %v2369_v25 }
 0x21c   : > { %v2129_v12 = vpop.f32.mrf.mxu1  ;;  %v2370_v63 = vmul.f32 0.5, %v2338_v27  ;;  %3143 = vtanh.f32 %v2278_v36  ;;  %v2126_v7 = vadd.f32 %v2125_v2, %v1933_v50  ;;  %v1937_v18 = vadd.f32 %v1936_v54, %v3948_v46 }
 0x21d   : > { %v3132_v22 = vpop.eup %3131  ;;  %3145 = vtanh.f32 %v2114_v44  ;;  %v1938_v33 = vpop.f32.mrf.mxu0 }
 0x21e   : > { %v2131_v56 = vpop.f32.mrf.mxu1  ;;  %v3134_v1 = vpop.eup %3133  ;;  %v2339_v10 = vadd.f32 1.0, %v3132_v22  ;;  %v2279_v41 = vmul.f32 0.5, %v2126_v7  ;;  %v2130_v24 = vadd.f32 %v2129_v12, %v1937_v18  ;;  %v1939_v51 = vadd.f32 %v1938_v33, %v3951_v57 }
 0x21f   : > { %v1940_v30 = vpop.f32.mrf.mxu0  ;;  %v4115_v53 = vmul.f32 %v3134_v1, %v2370_v63 }
 0x220   : > { %v2133_v43 = vpop.f32.mrf.mxu1  ;;  %v2371_v9 = vmul.f32 0.5, %v2339_v10  ;;  %3147 = vtanh.f32 %v2279_v41  ;;  %v2132_v17 = vadd.f32 %v2131_v56, %v1939_v51  ;;  %v1941_v13 = vadd.f32 %v1940_v30, %v3954_v0 }
 0x221   : > { %v3136_v46 = vpop.eup %3135  ;;  %3149 = vtanh.f32 %v2120_v16  ;;  %v1942_v44 = vpop.f32.mrf.mxu0 }
 0x222   : > { %v2135_v35 = vpop.f32.mrf.mxu1  ;;  %v3138_v60 = vpop.eup %3137  ;;  %v2340_v19 = vadd.f32 1.0, %v3136_v46  ;;  %v2280_v3 = vmul.f32 0.5, %v2132_v17  ;;  %v2134_v25 = vadd.f32 %v2133_v43, %v1941_v13  ;;  %v1943_v42 = vadd.f32 %v1942_v44, %v3958_v11 }
 0x223   : > { %v1946_v57 = vpop.f32.mrf.mxu0  ;;  %v4119_v40 = vmul.f32 %v3138_v60, %v2371_v9 }
 0x224   : > { %v2139_v23 = vpop.f32.mrf.mxu1  ;;  %v2372_v8 = vmul.f32 0.5, %v2340_v19  ;;  %3151 = vtanh.f32 %v2280_v3  ;;  %v2136_v2 = vadd.f32 %v2135_v35, %v1943_v42  ;;  %v1947_v6 = vadd.f32 %v1946_v57, %v3964_v21 }
 0x225   : > { %v3140_v0 = vpop.eup %3139  ;;  %3153 = vtanh.f32 %v2124_v31  ;;  %v1948_v16 = vpop.f32.mrf.mxu0 }
 0x226   : > { %v2141_v27 = vpop.f32.mrf.mxu1  ;;  %v3142_v36 = vpop.eup %3141  ;;  %v2341_v50 = vadd.f32 1.0, %v3140_v0  ;;  %v2281_v54 = vmul.f32 0.5, %v2136_v2  ;;  %v2140_v12 = vadd.f32 %v2139_v23, %v1947_v6  ;;  %v1949_v63 = vadd.f32 %v1948_v16, %v3967_v32 }
 0x227   : > { %v1950_v11 = vpop.f32.mrf.mxu0  ;;  %v4123_v18 = vmul.f32 %v3142_v36, %v2372_v8 }
 0x228   : > { %v2143_v7 = vpop.f32.mrf.mxu1  ;;  %v2373_v22 = vmul.f32 0.5, %v2341_v50  ;;  %3155 = vtanh.f32 %v2281_v54  ;;  %v2142_v33 = vadd.f32 %v2141_v27, %v1949_v63  ;;  %v1951_v56 = vadd.f32 %v1950_v11, %v3970_v38 }
 0x229   : > { %v3144_v21 = vpop.eup %3143  ;;  %3157 = vtanh.f32 %v2130_v24  ;;  %v1952_v31 = vpop.f32.mrf.mxu0 }
 0x22a   : > { %v2145_v1 = vpop.f32.mrf.mxu1  ;;  %v3146_v10 = vpop.eup %3145  ;;  %v2342_v41 = vadd.f32 1.0, %v3144_v21  ;;  %v2282_v51 = vmul.f32 0.5, %v2142_v33  ;;  %v2144_v30 = vadd.f32 %v2143_v7, %v1951_v56  ;;  %v1953_v43 = vadd.f32 %v1952_v31, %v3973_v45 }
 0x22b   : > { %v1956_v32 = vpop.f32.mrf.mxu0  ;;  %v4127_v17 = vmul.f32 %v3146_v10, %v2373_v22 }
 0x22c   : > { %v2149_v9 = vpop.f32.mrf.mxu1  ;;  %v2374_v13 = vmul.f32 0.5, %v2342_v41  ;;  %3159 = vtanh.f32 %v2282_v51  ;;  %v2146_v46 = vadd.f32 %v2145_v1, %v1953_v43  ;;  %v1957_v44 = vadd.f32 %v1956_v32, %v3976_v52 }
 0x22d   : > { %v3148_v38 = vpop.eup %3147  ;;  %3161 = vtanh.f32 %v2134_v25  ;;  %v1958_v24 = vpop.f32.mrf.mxu0 }
 0x22e   : > { %v2151_v35 = vpop.f32.mrf.mxu1  ;;  %v3150_v60 = vpop.eup %3149  ;;  %v2343_v19 = vadd.f32 1.0, %v3148_v38  ;;  %v2283_v3 = vmul.f32 0.5, %v2146_v46  ;;  %v2150_v42 = vadd.f32 %v2149_v9, %v1957_v44  ;;  %v1959_v57 = vadd.f32 %v1958_v24, %v3979_v61 }
 0x22f   : > { %v1960_v45 = vpop.f32.mrf.mxu0  ;;  %v4131_v8 = vmul.f32 %v3150_v60, %v2374_v13 }
 0x230   : > { %v2153_v23 = vpop.f32.mrf.mxu1  ;;  %v2375_v2 = vmul.f32 0.5, %v2343_v19  ;;  %3163 = vtanh.f32 %v2283_v3  ;;  %v2152_v6 = vadd.f32 %v2151_v35, %v1959_v57  ;;  %v1961_v0 = vadd.f32 %v1960_v45, %v3982_v5 }
 0x231   : > { %v3152_v52 = vpop.eup %3151  ;;  %3165 = vtanh.f32 %v2140_v12  ;;  %v1962_v25 = vpop.f32.mrf.mxu0 }
 0x232   : > { %v2155_v16 = vpop.f32.mrf.mxu1  ;;  %v3154_v27 = vpop.eup %3153  ;;  %v2344_v36 = vadd.f32 1.0, %v3152_v52  ;;  %v2284_v50 = vmul.f32 0.5, %v2152_v6  ;;  %v2154_v54 = vadd.f32 %v2153_v23, %v1961_v0  ;;  %v1963_v63 = vadd.f32 %v1962_v25, %v3985_v14 }
 0x233   : > { %v1966_v61 = vpop.f32.mrf.mxu0  ;;  %v4135_v7 = vmul.f32 %v3154_v27, %v2375_v2 }
 0x234   : > { %v2159_v11 = vpop.f32.mrf.mxu1  ;;  %v2376_v22 = vmul.f32 0.5, %v2344_v36  ;;  %3167 = vtanh.f32 %v2284_v50  ;;  %v2156_v33 = vadd.f32 %v2155_v16, %v1963_v63  ;;  %v1967_v56 = vadd.f32 %v1966_v61, %v3988_v20 }
 0x235   : > { %v3156_v5 = vpop.eup %3155  ;;  %3169 = vtanh.f32 %v2144_v30  ;;  %v1968_v12 = vpop.f32.mrf.mxu0 }
 0x236   : > { %v2161_v21 = vpop.f32.mrf.mxu1  ;;  %v3158_v31 = vpop.eup %3157  ;;  %v2345_v1 = vadd.f32 1.0, %v3156_v5  ;;  %v2285_v10 = vmul.f32 0.5, %v2156_v33  ;;  %v2160_v41 = vadd.f32 %v2159_v11, %v1967_v56  ;;  %v1969_v51 = vadd.f32 %v1968_v12, %v3991_v28 }
 0x237   : > { %v1970_v14 = vpop.f32.mrf.mxu0  ;;  %v4139_v32 = vmul.f32 %v3158_v31, %v2376_v22 }
 0x238   : > { %v2163_v43 = vpop.f32.mrf.mxu1  ;;  %v2377_v9 = vmul.f32 0.5, %v2345_v1  ;;  %3171 = vtanh.f32 %v2285_v10  ;;  %v2162_v13 = vadd.f32 %v2161_v21, %v1969_v51  ;;  %v1971_v46 = vadd.f32 %v1970_v14, %v3994_v37 }
 0x239   : > { %v3160_v20 = vpop.eup %3159  ;;  %3173 = vtanh.f32 %v2150_v42  ;;  %v1972_v30 = vpop.f32.mrf.mxu0 }
 0x23a   : > { %v2165_v44 = vpop.f32.mrf.mxu1  ;;  %v3162_v38 = vpop.eup %3161  ;;  %v2346_v24 = vadd.f32 1.0, %v3160_v20  ;;  %v2286_v35 = vmul.f32 0.5, %v2162_v13  ;;  %v2164_v60 = vadd.f32 %v2163_v43, %v1971_v46  ;;  %v1973_v19 = vadd.f32 %v1972_v30, %v3997_v47 }
 0x23b   : > { %v1976_v28 = vpop.f32.mrf.mxu0  ;;  %v4143_v57 = vmul.f32 %v3162_v38, %v2377_v9 }
 0x23c   : > { %v2169_v3 = vpop.f32.mrf.mxu1  ;;  %v2378_v45 = vmul.f32 0.5, %v2346_v24  ;;  %3175 = vtanh.f32 %v2286_v35  ;;  %v2166_v23 = vadd.f32 %v2165_v44, %v1973_v19  ;;  %v1977_v2 = vadd.f32 %v1976_v28, %v4000_v58 }
 0x23d   : > { %v3164_v37 = vpop.eup %3163  ;;  %3177 = vtanh.f32 %v2154_v54  ;;  %v1978_v42 = vpop.f32.mrf.mxu0 }
 0x23e   : > { %v2171_v6 = vpop.f32.mrf.mxu1  ;;  %v3166_v0 = vpop.eup %3165  ;;  %v2347_v52 = vadd.f32 1.0, %v3164_v37  ;;  %v2287_v25 = vmul.f32 0.5, %v2166_v23  ;;  %v2170_v16 = vadd.f32 %v2169_v3, %v1977_v2  ;;  %v1979_v27 = vadd.f32 %v1978_v42, %v4003_v4  ;;  %v4158_v3 = vld [vmem:[#allocation8] sm:$0xff] }
 0x23f   : > { %v1980_v47 = vpop.f32.mrf.mxu0  ;;  %v4147_v50 = vmul.f32 %v3166_v0, %v2378_v45  ;;  %2842 = vmatprep.mubr.f32.mxu0 %v4158_v3 }
 0x240   : > { %v2173_v36 = vpop.f32.mrf.mxu1  ;;  %v2379_v63 = vmul.f32 0.5, %v2347_v52  ;;  %3179 = vtanh.f32 %v2287_v25  ;;  %v2172_v61 = vadd.f32 %v2171_v6, %v1979_v27  ;;  %v1981_v11 = vadd.f32 %v1980_v47, %v4006_v15  ;;  %v2431_v47 = vld [vmem:[%s4287_s4] sm:$0xff] }
 0x241   : > { %v3168_v58 = vpop.eup %3167  ;;  %3181 = vtanh.f32 %v2160_v41  ;;  %v1982_v54 = vpop.f32.mrf.mxu0 }
 0x242   : > { %v2175_v22 = vpop.f32.mrf.mxu1  ;;  %v3170_v33 = vpop.eup %3169  ;;  %v2348_v56 = vadd.f32 1.0, %v3168_v58  ;;  %v2288_v5 = vmul.f32 0.5, %v2172_v61  ;;  %v2174_v12 = vadd.f32 %v2173_v36, %v1981_v11  ;;  %v1983_v21 = vadd.f32 %v1982_v54, %v4009_v26 }
 0x243   : > { %v1986_v4 = vpop.f32.mrf.mxu0  ;;  %v4151_v1 = vmul.f32 %v3170_v33, %v2379_v63  ;;  %v4327_v33 = vld [vmem:[#allocation18_spill] sm:$0xff] }
 0x244   : > { %v2179_v31 = vpop.f32.mrf.mxu1  ;;  %v2380_v10 = vmul.f32 0.5, %v2348_v56  ;;  %3183 = vtanh.f32 %v2288_v5  ;;  %v2176_v51 = vadd.f32 %v2175_v22, %v1983_v21  ;;  %v1987_v14 = vadd.f32 %v1986_v4, %v4012_v34 }
 0x245   : > { %v3172_v15 = vpop.eup %3171  ;;  %3185 = vtanh.f32 %v2164_v60  ;;  %v1988_v41 = vpop.f32.mrf.mxu0  ;;  %v3427_v5 = vmov 0  }
 0x246   : > { %v2181_v43 = vpop.f32.mrf.mxu1  ;;  %v3174_v9 = vpop.eup %3173  ;;  %v2349_v13 = vadd.f32 1.0, %v3172_v15  ;;  %v2289_v46 = vmul.f32 0.5, %v2176_v51  ;;  %v2180_v20 = vadd.f32 %v2179_v31, %v1987_v14  ;;  %v1989_v30 = vadd.f32 %v1988_v41, %v4015_v49  ;;  %v4325_v49 = vld [vmem:[#allocation16_spill] sm:$0xff]  ;;  %2920 = vset.pattern.permute.xlu0 %v3427_v5  ;;  %v4328_v14 = vld [vmem:[#allocation19_spill] sm:$0xff] }
 0x247   : > { %v1990_v26 = vpop.f32.mrf.mxu0  ;;  %v4155_v38 = vmul.f32 %v3174_v9, %v2380_v10  ;;  %2434 = vperm.xlu0 %2920, %v2431_v47  }
 0x248   : > { %v2183_v44 = vpop.f32.mrf.mxu1  ;;  %v2381_v24 = vmul.f32 0.5, %v2349_v13  ;;  %3187 = vtanh.f32 %v2289_v46  ;;  %v2182_v35 = vadd.f32 %v2181_v43, %v1989_v30  ;;  %v1991_v19 = vadd.f32 %v1990_v26, %v4018_v62  ;;  %v4329_v26 = vld [vmem:[#allocation20_spill] sm:$0xff] }
 0x249   : > { %v3176_v34 = vpop.eup %3175  ;;  %3189 = vtanh.f32 %v2170_v16  ;;  %v1992_v60 = vpop.f32.mrf.mxu0  ;;  %v4326_v16 = vld [vmem:[#allocation17_spill] sm:$0xff] }
 0x24a   : > { %v2185_v28 = vpop.f32.mrf.mxu1  ;;  %v3178_v45 = vpop.eup %3177  ;;  %v2350_v23 = vadd.f32 1.0, %v3176_v34  ;;  %v2290_v2 = vmul.f32 0.5, %v2182_v35  ;;  %v2184_v37 = vadd.f32 %v2183_v44, %v1991_v19  ;;  %v1993_v42 = vadd.f32 %v1992_v60, %v4325_v49 }
 0x24b   : > { %v1996_v6 = vpop.f32.mrf.mxu0  ;;  %v4162_v52 = vmul.f32 %v3178_v45, %v2381_v24 }
 0x24c   : > { %v2189_v0 = vpop.f32.mrf.mxu1  ;;  %v2382_v25 = vmul.f32 0.5, %v2350_v23  ;;  %3191 = vtanh.f32 %v2290_v2  ;;  %v2186_v62 = vadd.f32 %v2185_v28, %v1993_v42  ;;  %v1997_v27 = vadd.f32 %v1996_v6, %v4326_v16  ;;  %v4330_v42 = vld [vmem:[#allocation22_spill] sm:$0xff] }
 0x24d   : > { %v3180_v36 = vpop.eup %3179  ;;  %3193 = vtanh.f32 %v2174_v12  ;;  %v1998_v63 = vpop.f32.mrf.mxu0 }
 0x24e   : > { %v2191_v61 = vpop.f32.mrf.mxu1  ;;  %v3182_v11 = vpop.eup %3181  ;;  %v2351_v58 = vadd.f32 1.0, %v3180_v36  ;;  %v2291_v54 = vmul.f32 0.5, %v2186_v62  ;;  %v2190_v22 = vadd.f32 %v2189_v0, %v1997_v27  ;;  %v1999_v56 = vadd.f32 %v1998_v63, %v4327_v33  ;;  %v4331_v36 = vld [vmem:[#allocation21_spill] sm:$0xff]  ;;  %v4332_v33 = vld [vmem:[#allocation24_spill] sm:$0xff] }
 0x24f   : > { %v2000_v21 = vpop.f32.mrf.mxu0  ;;  %v4169_v31 = vmul.f32 %v3182_v11, %v2382_v25 }
 0x250   : > { %v2193_v4 = vpop.f32.mrf.mxu1  ;;  %v2383_v10 = vmul.f32 0.5, %v2351_v58  ;;  %3195 = vtanh.f32 %v2291_v54  ;;  %v2192_v51 = vadd.f32 %v2191_v61, %v1999_v56  ;;  %v2001_v12 = vadd.f32 %v2000_v21, %v4328_v14 }
 0x251   : > { %v3184_v15 = vpop.eup %3183  ;;  %3197 = vtanh.f32 %v2180_v20  ;;  %v2002_v41 = vpop.f32.mrf.mxu0 }
 0x252   : > { %v2195_v43 = vpop.f32.mrf.mxu1  ;;  %v3186_v9 = vpop.eup %3185  ;;  %v2352_v13 = vadd.f32 1.0, %v3184_v15  ;;  %v2292_v46 = vmul.f32 0.5, %v2192_v51  ;;  %v2194_v30 = vadd.f32 %v2193_v4, %v2001_v12  ;;  %v2003_v44 = vadd.f32 %v2002_v41, %v4329_v26  ;;  %v4334_v26 = vld [vmem:[#allocation26_spill] sm:$0xff] }
 0x253   : > { %v2006_v24 = vpop.f32.mrf.mxu0  ;;  %v4173_v19 = vmul.f32 %v3186_v9, %v2383_v10 }
 0x254   : > { %v2199_v35 = vpop.f32.mrf.mxu1  ;;  %v2384_v34 = vmul.f32 0.5, %v2352_v13  ;;  %3199 = vtanh.f32 %v2292_v46  ;;  %v2196_v60 = vadd.f32 %v2195_v43, %v2003_v44  ;;  %v2007_v63 = vadd.f32 %v2006_v24, %v4331_v36  ;;  %v4335_v24 = vld [vmem:[#allocation25_spill] sm:$0xff]  ;;  %v4337_v36 = vld [vmem:[#allocation27_spill] sm:$0xff] }
 0x255   : > { %v3188_v28 = vpop.eup %3187  ;;  %3201 = vtanh.f32 %v2184_v37  ;;  %v2008_v45 = vpop.f32.mrf.mxu0 }
 0x256   : > { %v2201_v23 = vpop.f32.mrf.mxu1  ;;  %v3190_v20 = vpop.eup %3189  ;;  %v2353_v2 = vadd.f32 1.0, %v3188_v28  ;;  %v2293_v49 = vmul.f32 0.5, %v2196_v60  ;;  %v2009_v6 = vadd.f32 %v2008_v45, %v4330_v42  ;;  %v2200_v12 = vadd.f32 %v2199_v35, %v2007_v63 }
 0x257   : > { %v2010_v0 = vpop.f32.mrf.mxu0  ;;  %v4176_v62 = vmul.f32 %v3190_v20, %v2384_v34 }
 0x258   : > { %v2203_v25 = vpop.f32.mrf.mxu1  ;;  %v2385_v16 = vmul.f32 0.5, %v2353_v2  ;;  %3203 = vtanh.f32 %v2293_v49  ;;  %v2202_v27 = vadd.f32 %v2201_v23, %v2009_v6 }
 0x259   : > { %v3192_v47 = vpop.eup %3191  ;;  %3205 = vtanh.f32 %v2190_v22  ;;  %v2012_v61 = vpop.f32.mrf.mxu0  ;;  %v4333_v22 = vld [vmem:[#allocation23_spill] sm:$0xff] }
 0x25a   : > { %v2205_v37 = vpop.f32.mrf.mxu1  ;;  %v3194_v11 = vpop.eup %3193  ;;  %v2354_v58 = vadd.f32 1.0, %v3192_v47  ;;  %v2294_v54 = vmul.f32 0.5, %v2202_v27  ;;  %v2013_v56 = vadd.f32 %v2012_v61, %v4332_v33  ;;  %v2011_v15 = vadd.f32 %v2010_v0, %v4333_v22  ;;  %v4339_v22 = vld [vmem:[#allocation29_spill] sm:$0xff] }
 0x25b   : > { %v2016_v5 = vpop.f32.mrf.mxu0  ;;  %v4180_v4 = vmul.f32 %v3194_v11, %v2385_v16  ;;  %v4336_v16 = vld [vmem:[#allocation28_spill] sm:$0xff] }
 0x25c   : > { %v2209_v21 = vpop.f32.mrf.mxu1  ;;  %v2386_v10 = vmul.f32 0.5, %v2354_v58  ;;  %3207 = vtanh.f32 %v2294_v54  ;;  %v2206_v51 = vadd.f32 %v2205_v37, %v2013_v56  ;;  %v2017_v34 = vadd.f32 %v2016_v5, %v4335_v24 }
 0x25d   : > { %v3196_v14 = vpop.eup %3195  ;;  %3209 = vtanh.f32 %v2194_v30  ;;  %v2018_v41 = vpop.f32.mrf.mxu0  ;;  %v2204_v35 = vadd.f32 %v2203_v25, %v2011_v15 }
 0x25e   : > { %v2211_v43 = vpop.f32.mrf.mxu1  ;;  %v3198_v9 = vpop.eup %3197  ;;  %v2355_v13 = vadd.f32 1.0, %v3196_v14  ;;  %v2295_v46 = vmul.f32 0.5, %v2206_v51  ;;  %v2019_v44 = vadd.f32 %v2018_v41, %v4334_v26  ;;  %v2210_v47 = vadd.f32 %v2209_v21, %v2017_v34  ;;  %v4338_v14 = vld [vmem:[#allocation30_spill] sm:$0xff] }
 0x25f   : > { %v2020_v60 = vpop.f32.mrf.mxu0  ;;  %v4185_v45 = vmul.f32 %v3198_v9, %v2386_v10 }
 0x260   : > { %v2213_v28 = vpop.f32.mrf.mxu1  ;;  %v2387_v23 = vmul.f32 0.5, %v2355_v13  ;;  %3211 = vtanh.f32 %v2295_v46  ;;  %v2212_v20 = vadd.f32 %v2211_v43, %v2019_v44  ;;  %v2021_v63 = vadd.f32 %v2020_v60, %v4337_v36 }
 0x261   : > { %v3200_v30 = vpop.eup %3199  ;;  %3213 = vtanh.f32 %v2200_v12  ;;  %v2022_v2 = vpop.f32.mrf.mxu0 }
 0x262   : > { %v2215_v49 = vpop.f32.mrf.mxu1  ;;  %v3202_v42 = vpop.eup %3201  ;;  %v2356_v6 = vadd.f32 1.0, %v3200_v30  ;;  %v2296_v0 = vmul.f32 0.5, %v2212_v20  ;;  %v2023_v27 = vadd.f32 %v2022_v2, %v4336_v16  ;;  %v2214_v21 = vadd.f32 %v2213_v28, %v2021_v63  ;;  %v4340_v20 = vld [vmem:[#allocation32_spill] sm:$0xff]  ;;  %v4341_v28 = vld [vmem:[#allocation31_spill] sm:$0xff] }
 0x263   : > { %v2026_v61 = vpop.f32.mrf.mxu0  ;;  %v4189_v11 = vmul.f32 %v3202_v42, %v2387_v23 }
 0x264   : > { %v2219_v37 = vpop.f32.mrf.mxu1  ;;  %v2388_v58 = vmul.f32 0.5, %v2356_v6  ;;  %3215 = vtanh.f32 %v2296_v0  ;;  %v2216_v54 = vadd.f32 %v2215_v49, %v2023_v27  ;;  %v2027_v15 = vadd.f32 %v2026_v61, %v4339_v22 }
 0x265   : > { %v3204_v33 = vpop.eup %3203  ;;  %3217 = vtanh.f32 %v2204_v35  ;;  %v2028_v25 = vpop.f32.mrf.mxu0 }
 0x266   : > { %v2221_v56 = vpop.f32.mrf.mxu1  ;;  %v3206_v5 = vpop.eup %3205  ;;  %v2357_v10 = vadd.f32 1.0, %v3204_v33  ;;  %v2297_v51 = vmul.f32 0.5, %v2216_v54  ;;  %v2029_v12 = vadd.f32 %v2028_v25, %v4338_v14  ;;  %3219 = vtanh.f32 %v2210_v47  ;;  %v4342_v54 = vld [vmem:[#allocation34_spill] sm:$0xff] }
 0x267   : > { %v2030_v41 = vpop.f32.mrf.mxu0  ;;  %v4193_v9 = vmul.f32 %v3206_v5, %v2388_v58  ;;  %v2220_v35 = vadd.f32 %v2219_v37, %v2027_v15  ;;  %v4343_v37 = vld [vmem:[#allocation33_spill] sm:$0xff] }
 0x268   : > { %v2223_v43 = vpop.f32.mrf.mxu1  ;;  %v2389_v13 = vmul.f32 0.5, %v2357_v10  ;;  %3221 = vtanh.f32 %v2297_v51  ;;  %v2222_v46 = vadd.f32 %v2221_v56, %v2029_v12  ;;  %v2031_v2 = vadd.f32 %v2030_v41, %v4341_v28 }
 0x269   : > { %v3208_v26 = vpop.eup %3207  ;;  %v2032_v44 = vpop.f32.mrf.mxu0  ;;  %3223 = vtanh.f32 %v2214_v21 }
 0x26a   : > { %v2225_v24 = vpop.f32.mrf.mxu1  ;;  %v3210_v34 = vpop.eup %3209  ;;  %v2358_v60 = vadd.f32 1.0, %v3208_v26  ;;  %v2298_v23 = vmul.f32 0.5, %v2222_v46  ;;  %v2033_v30 = vadd.f32 %v2032_v44, %v4340_v20  ;;  %v2224_v25 = vadd.f32 %v2223_v43, %v2031_v2 }
 0x26b   : > { %v2036_v49 = vpop.f32.mrf.mxu0  ;;  %v4197_v6 = vmul.f32 %v3210_v34, %v2389_v13 }
 0x26c   : > { %v2229_v42 = vpop.f32.mrf.mxu1  ;;  %v2390_v0 = vmul.f32 0.5, %v2358_v60  ;;  %3225 = vtanh.f32 %v2298_v23  ;;  %v2226_v16 = vadd.f32 %v2225_v24, %v2033_v30  ;;  %v2037_v56 = vadd.f32 %v2036_v49, %v4343_v37  ;;  %v4344_v60 = vld [vmem:[#allocation35_spill] sm:$0xff] }
 0x26d   : > { %v3212_v27 = vpop.eup %3211  ;;  %v2038_v47 = vpop.f32.mrf.mxu0  ;;  %3227 = vtanh.f32 %v2220_v35 }
 0x26e   : > { %v2231_v36 = vpop.f32.mrf.mxu1  ;;  %v3214_v63 = vpop.eup %3213  ;;  %v2359_v61 = vadd.f32 1.0, %v3212_v27  ;;  %v2299_v58 = vmul.f32 0.5, %v2226_v16  ;;  %v2039_v33 = vadd.f32 %v2038_v47, %v4342_v54  ;;  %v2230_v26 = vadd.f32 %v2229_v42, %v2037_v56 }
 0x26f   : > { %v2040_v5 = vpop.f32.mrf.mxu0  ;;  %v4201_v51 = vmul.f32 %v3214_v63, %v2390_v0 }
 0x270   : > { %v2233_v10 = vpop.f32.mrf.mxu1  ;;  %v2391_v14 = vmul.f32 0.5, %v2359_v61  ;;  %3229 = vtanh.f32 %v2299_v58  ;;  %v2232_v12 = vadd.f32 %v2231_v36, %v2039_v33  ;;  %v2041_v23 = vadd.f32 %v2040_v5, %v4344_v60 }
 0x271   : > { %v3216_v21 = vpop.eup %3215  ;;  %v2042_v22 = vpop.f32.mrf.mxu0  ;;  %3231 = vtanh.f32 %v2224_v25 }
 0x272   : > { %v3218_v15 = vpop.eup %3217  ;;  %v2360_v41 = vadd.f32 1.0, %v3216_v21  ;;  %v2300_v13 = vmul.f32 0.5, %v2232_v12  ;;  %v2043_v46 = vadd.f32 %v2042_v22, %v4081_v39  ;;  %v2235_v44 = vpop.f32.mrf.mxu1  ;;  %v2234_v16 = vadd.f32 %v2233_v10, %v2041_v23 }
 0x273   : > { %v2423_v43 = vmul.f32 %v3218_v15, %v2391_v14  ;;  %v3220_v24 = vpop.eup %3219 }
 0x274   : > { %v2392_v34 = vmul.f32 0.5, %v2360_v41  ;;  %3233 = vtanh.f32 %v2300_v13  ;;  %v2236_v20 = vadd.f32 %v2235_v44, %v2043_v46 }
 0x275   : > { %v3222_v30 = vpop.eup %3221  ;;  %3235 = vtanh.f32 %v2230_v26 }
 0x276   : > { %v2361_v35 = vadd.f32 1.0, %v3222_v30  ;;  %v2301_v28 = vmul.f32 0.5, %v2236_v20  ;;  %v2424_v2 = vmul.f32 %v3220_v24, %v2392_v34  ;;  %v3224_v49 = vpop.eup %3223 }
 0x278   : > { %v2393_v0 = vmul.f32 0.5, %v2361_v35  ;;  %3237 = vtanh.f32 %v2301_v28 }
 0x279   : > { %v3226_v39 = vpop.eup %3225  ;;  %3239 = vtanh.f32 %v2234_v16 }
 0x27a   : > { %v2362_v27 = vadd.f32 1.0, %v3226_v39  ;;  %v2425_v42 = vmul.f32 %v3224_v49, %v2393_v0  ;;  %v3228_v47 = vpop.eup %3227 }
 0x27c   : > { %v2394_v36 = vmul.f32 0.5, %v2362_v27 }
 0x27d   : > { %v3230_v63 = vpop.eup %3229 }
 0x27e   : > { %v2363_v61 = vadd.f32 1.0, %v3230_v63  ;;  %v2426_v58 = vmul.f32 %v3228_v47, %v2394_v36  ;;  %v3232_v54 = vpop.eup %3231 }
 0x280   : > { %v2395_v33 = vmul.f32 0.5, %v2363_v61 }
 0x281   : > { %v3234_v25 = vpop.eup %3233 }
 0x282   : > { %v2364_v37 = vadd.f32 1.0, %v3234_v25  ;;  %v2427_v56 = vmul.f32 %v3232_v54, %v2395_v33  ;;  %v3236_v5 = vpop.eup %3235 }
 0x284   : > { %v2396_v14 = vmul.f32 0.5, %v2364_v37 }
 0x285   : > { %v3238_v12 = vpop.eup %3237 }
 0x286   : > { %v2365_v21 = vadd.f32 1.0, %v3238_v12  ;;  %v2428_v10 = vmul.f32 %v3236_v5, %v2396_v14  ;;  %v3240_v15 = vpop.eup %3239 }
 0x288   : > { %v2397_v22 = vmul.f32 0.5, %v2365_v21 }
 0x28a   : > { %v2429_v41 = vmul.f32 %v3240_v15, %v2397_v22 }
 0x28c   : > { %2810 = vmatprep.subr.mxu0 %v2429_v41 }
 0x28d   : > { %2811 = vmatpush3.xpose.msra.mxu0 %v4162_v52 }
 0x28e   : > { %2812 = vmatprep.subr.mxu0 %v2428_v10 }
 0x291   : > { %2813 = vmatpush3.xpose.msra.mxu0 %v4155_v38 }
 0x292   : > { %2814 = vmatprep.subr.mxu0 %v2427_v56 }
 0x295   : > { %2815 = vmatpush3.xpose.msra.mxu0 %v4151_v1  ;;  %v4346_v1 = vlaneseq }
 0x296   : > { %2816 = vmatprep.subr.mxu0 %v2426_v58 }
 0x297   : > { %vm2528_vm0 = vcmp.lt.s32.totalorder %v4346_v1, 256 }
 0x299   : > { %2817 = vmatpush3.xpose.msra.mxu0 %v4147_v50 }
 0x29a   : > { %2818 = vmatprep.subr.mxu0 %v2425_v42 }
 0x29d   : > { %2819 = vmatpush3.xpose.msra.mxu0 %v4143_v57 }
 0x29e   : > { %2820 = vmatprep.subr.mxu0 %v2424_v2 }
 0x2a1   : > { %2821 = vmatpush3.xpose.msra.mxu0 %v4139_v32 }
 0x2a2   : > { %2822 = vmatprep.subr.mxu0 %v2423_v43 }
 0x2a5   : > { %2823 = vmatpush3.xpose.msra.mxu0 %v4135_v7 }
 0x2a6   : > { %2824 = vmatprep.subr.mxu0 %v4201_v51 }
 0x2a9   : > { %2825 = vmatpush3.xpose.msra.mxu0 %v4131_v8 }
 0x2aa   : > { %2826 = vmatprep.subr.mxu0 %v4197_v6 }
 0x2ad   : > { %2827 = vmatpush3.xpose.msra.mxu0 %v4127_v17 }
 0x2ae   : > { %2828 = vmatprep.subr.mxu0 %v4193_v9 }
 0x2b1   : > { %2829 = vmatpush3.xpose.msra.mxu0 %v4123_v18 }
 0x2b2   : > { %2830 = vmatprep.subr.mxu0 %v4189_v11 }
 0x2b5   : > { %2831 = vmatpush3.xpose.msra.mxu0 %v4119_v40 }
 0x2b6   : > { %2832 = vmatprep.subr.mxu0 %v4185_v45 }
 0x2b9   : > { %2833 = vmatpush3.xpose.msra.mxu0 %v4115_v53  ;;  %v3428_v53 = vmov 1966171168  }
 0x2ba   : > { %2834 = vmatprep.subr.mxu0 %v4180_v4  ;;  %v2512_v40 = vunpack.c.l.s4 %v3428_v53 }
 0x2bc   : > { %v2513_v18 = vunpack.c.0.s8 %v2512_v40 }
 0x2bd   : > { %2835 = vmatpush3.xpose.msra.mxu0 %v4111_v55 }
 0x2be   : > { %2836 = vmatprep.subr.mxu0 %v4176_v62 }
 0x2c1   : > { %2837 = vmatpush3.xpose.msra.mxu0 %v4107_v59  ;;  %v4345_v59 = vld [vmem:[#allocation15_spill] sm:$0xff] }
 0x2c2   : > { %2838 = vmatprep.subr.mxu0 %v4173_v19  ;;  %v2435_v17 = vpop.permute.xlu0 %2434  ;;  %v2516_v57 = vsub.s32 %v2513_v18, %v4345_v59 }
 0x2c5   : > { %2839 = vmatpush3.xpose.msra.mxu0 %v4104_v29 }
 0x2c6   : > { %2840 = vmatprep.subr.mxu0 %v4169_v31 }
 0x2c9   : > { %2841 = vmatpush3.xpose.msra.mxu0 %v4099_v48 }
 0x2cc   : > { %2843 = vmatmul.mubr.f32.vlgmr.msra.gmra.mxu0 %v4158_v3 }
 0x38c   : > { %v2503_v55 = vpop.f32.mrf.mxu0 }
 0x38d   : > { %v2504_v7 = vadd.f32 %v2503_v55, %v2435_v17 }
 0x38e   : > { %v2505_v8 = vpop.f32.mrf.mxu0 }
 0x38f   : > { %v2506_v32 = vadd.f32 %v2505_v8, %v2435_v17 }
 0x391   : > { %v2510_v50 = vcombine.low %v2504_v7, %v2506_v32 }
 0x393   : > { %v2517_v29 = vrot.slane %v2510_v50, %v2516_v57  ;;  %2538 = sbr.rel (!%p4347_p1) target bundleno = 946 (0x3b2), region = 60 }
 0x395   : > { %v2524_v38 = vrot.slane %v2517_v29, %v2516_v57 }
 0x397   : > { %2530 = vst.msk [vmem:[%s290_s25] sm:$0x3] %vm2528_vm0, %v2524_v38 }
 0x398   : > { %s4356_s26 = smov (!%p2541_p6, %s2540_s26), 2 }
 0x399   : > { %s4238_s28 = sshll.u32 %s4356_s26, 4 }
 0x39a   : > { %s2545_s8 = ssub.s32 32, %s4238_s28 }
 0x39b   : > { %2546 = vsyncadd %s2532_s11, %s2545_s8  ;;  %p2802_p11 = scmp.ne.s32.totalorder %s4238_s28, 0  ;;  %s2809_s9 = sshll.u32 %s3481_s22, 5 }
 0x39c   : > { %s2549_s12 = scalar_lea.hbm %s4288_s5, %s2809_s9  ;;  %s2551_s16 = sshll.u32 %s290_s25, 4  ;;  %s2552_s16 = int_to_ptr.vmem [resolvable:$true] %s2551_s16 }
 0x39d   : > { %s3345_s17 = scalar_lea.vmem %s2552_s16, %s4238_s28  ;;  %s3429_s23 = smov [#allocation10]  }
 0x39e   : > { %p3346_p3 = scmp.ne.s32.totalorder %s2552_s16, %s3345_s17  ;;  %s3349_s29 = sshll.u32 %s3429_s23, 4  ;;  %s3350_s29 = int_to_ptr.vmem [resolvable:$false] %s3349_s29 }
 0x39f   : > { %s3351_s7 = scalar_lea.vmem %s3350_s29, 64  ;;  %p3352_p9 = scmp.lt.s32.totalorder %s2552_s16, %s3350_s29 }
 0x3a0   : > { %p3347_p0 = pnand %p3346_p3, %p2802_p11  ;;  %p3353_p8 = scmp.lt.s32.totalorder %s3351_s7, %s3345_s17 }
 0x3a2   : > { %p3348_p2 = pneg %p3347_p0  ;;  %p3354_p12 = por %p3353_p8, %p3352_p9 }
 0x3a4   : > { %p3355_p5 = pnand %p3354_p12, %p3348_p2 }
 0x3a6   : > { %3358 = shalt.err (!%p3355_p5)
}
 0x3a7   : > { %s3359_s22 = scalar_lea.hbm %s2549_s12, %s4238_s28  ;;  %s3363_s13 = scalar_lea.hbm %s4288_s5, 48 }
 0x3a8   : > { %p3360_p13 = scmp.ne.s32.totalorder %s2549_s12, %s3359_s22  ;;  %p3364_p1 = scmp.lt.s32.totalorder %s2549_s12, %s4288_s5 }
 0x3a9   : > { %p3365_p6 = scmp.lt.s32.totalorder %s3363_s13, %s3359_s22 }
 0x3aa   : > { %p3361_p4 = pnand %p3360_p13, %p2802_p11 }
 0x3ab   : > { %p3366_p3 = por %p3365_p6, %p3364_p1 }
 0x3ac   : > { %p3362_p10 = pneg %p3361_p4 }
 0x3ae   : > { %p3367_p0 = pnand %p3366_p3, %p3362_p10 }
 0x3b0   : > { %3370 = shalt.err (!%p3367_p0)
}
 0x3b1   : > { %2554 = dma.vmem_to_hbm [thread:$0]  (%p2802_p11), %s2552_s16, %s4238_s28, %s2549_s12, %s2532_s11  }
 0x3b2 PF: > { %s2563_s9 = sand.u32 1, %s3405_s18   ;;  %p4348_p2 = scmp.ne.s32.totalorder %s4296_s6, 0 }
 0x3b3   : > { %s2564_s30 = scalar_lea.sflag [#allocation4], %s2563_s9 }
 0x3b4   : > { %p2869_p9 = pnand %p2655_p7, %p4348_p2 }
 0x3b6   : > { %p2870_p8 = pneg %p2869_p9 }
 0x3b8   : > { %3400 = dma.done.wait (%p2870_p8), %s2564_s30, 32  }
 0x3b9   : > { %3402 = vsyncadd (%p2870_p8), %s2564_s30, 4294967264  ;;  %p20_p12 = scmp.ge.s32.totalorder %s3485_s24, 4   ;;  %s4349_s18 = smov %s3409_s19 }
 0x3ba   : > { %s4350_s19 = smov %s3413_s20  ;;  %s4351_s20 = smov %s3497_s27 }
 0x3bb   : > { %s4352_s21 = smov %s3485_s24  ;;  %22 = sbr.rel (!%p20_p12) target bundleno = 7 (0x7), region = 97 }
 0x3c0   :  { %2569 = vsyncpa [#allocation3], 1 }
 0x3c1   :  { %2571 = vsyncpa [#allocation3 + $0x1], 1 }
 0x3c2   :  { %2572 = vsyncpa [#allocation6], 1 }
 0x3c3   :  { %2573 = vsyncpa [#allocation9], 1 }
 0x3c4   :  { %2574 = vsyncpa [#allocation4], 1 }
 0x3c5   :  { %2576 = vsyncpa [#allocation4 + $0x1], 1 }

</bundles_post_ra>
